<compile_context>
chip_gen: v6e
topology: v6e:2x2x1
jax: 0.10.0
libtpu: 0.0.40
codegen_flags: <defaults>
</compile_context>

<pallas_src>
import functools
import math

import jax
import jax.numpy as jnp
from jax.experimental import pallas as pl
from jax.experimental.pallas import tpu as pltpu


def _vae_kernel(x_ref, eps_ref,
                we1_ref, be1_ref, wemv_ref, bemv_ref,
                wd1_ref, bd1_ref, wdmv_ref, bdmv_ref,
                x_mean_ref, x_var_ref, zpack_ref,
                *, latent_dim, feat_dim):
    x = x_ref[...]          # f32 [B, D]
    eps = eps_ref[...]      # f32 [B, Z]

    # ---------------- encoder ----------------
    # bf16 weight on the MXU, f32 accumulation; activations stay f32 (VPU/EUP).
    h = jnp.tanh(
        jnp.dot(x.astype(jnp.bfloat16), we1_ref[...],
                preferred_element_type=jnp.float32) + be1_ref[...])

    # fused encoder heads: single (H, 2Z) f32 matmul (tiny weight; the variance
    # half feeds exp(), so it is kept full precision), then split mean | log_var.
    hz = jnp.dot(h, wemv_ref[...],
                 preferred_element_type=jnp.float32) + bemv_ref[...]
    z_mean = hz[:, :latent_dim]
    z_log_var = hz[:, latent_dim:]

    # reparameterization trick (eps supplied deterministically from outside)
    z = z_mean + jnp.exp(0.5 * z_log_var) * eps

    # ---------------- decoder ----------------
    hd = jnp.tanh(
        jnp.dot(z.astype(jnp.bfloat16), wd1_ref[...],
                preferred_element_type=jnp.float32) + bd1_ref[...])

    # fused decoder heads: single lane-dense (H, 2D) matmul, then split.
    od = jnp.dot(hd.astype(jnp.bfloat16), wdmv_ref[...],
                 preferred_element_type=jnp.float32) + bdmv_ref[...]
    x_mean_ref[...] = jax.nn.sigmoid(od[:, :feat_dim])
    x_var_ref[...] = jnp.exp(od[:, feat_dim:])

    # lane-dense packed latents built from the already-contiguous hz slab:
    #   [z | z_mean | z_log_var | pad] == [z | hz | pad]  -> 4*Z = 128 lanes.
    zpack_ref[...] = jnp.concatenate([z, hz, jnp.zeros_like(z)], axis=-1)


def prepare_params(params):
    """One-time weight fusion / casting.  Call ONCE and cache the result;
    the per-step `vae_forward` does no concat/convert work."""
    return {
        # encoder
        "we1": params["we1"].astype(jnp.bfloat16),
        "be1": params["be1"],
        # encoder heads fused; kept f32 (tiny, and variance half feeds exp()).
        "wemv": jnp.concatenate([params["wem"], params["wev"]], axis=1),
        "bemv": jnp.concatenate([params["bem"], params["bev"]], axis=1),
        # decoder
        "wd1": params["wd1"].astype(jnp.bfloat16),
        "bd1": params["bd1"],
        # decoder heads fused into one lane-dense (H, 2D) bf16 weight.
        "wdmv": jnp.concatenate([params["wdm"], params["wdv"]],
                                axis=1).astype(jnp.bfloat16),
        "bdmv": jnp.concatenate([params["bdm"], params["bdv"]], axis=1),
    }


@jax.jit
def vae_forward(x_nchw, eps, prep):
    """x_nchw: [B, C, H, W] f32; eps: [B, Z] f32; prep: output of prepare_params.
    Returns (x_mean, x_var, z, z_mean, z_log_var) matching the PyTorch forward."""
    B = x_nchw.shape[0]
    D = x_nchw.shape[1] * x_nchw.shape[2] * x_nchw.shape[3]
    x = x_nchw.reshape(B, D)            # flatten NCHW -> [B, D]

    H = prep["we1"].shape[1]
    Z = prep["wd1"].shape[0]

    args = (x, eps,
            prep["we1"], prep["be1"], prep["wemv"], prep["bemv"],
            prep["wd1"], prep["bd1"], prep["wdmv"], prep["bdmv"])

    out_shape = (
        jax.ShapeDtypeStruct((B, D), jnp.float32),       # x_mean
        jax.ShapeDtypeStruct((B, D), jnp.float32),       # x_var
        jax.ShapeDtypeStruct((B, 4 * Z), jnp.float32),   # [z | z_mean | z_log_var | pad]
    )

    vmem = pl.BlockSpec(memory_space=pltpu.MemorySpace.VMEM)

    flops = 2 * B * (D * H + H * 2 * Z + Z * H + H * 2 * D)
    transcendentals = B * (2 * H + Z + 2 * D)
    bytes_accessed = (
        sum(int(a.size) * a.dtype.itemsize for a in args)
        + sum(math.prod(s.shape) * jnp.dtype(s.dtype).itemsize for s in out_shape)
    )

    x_mean, x_var, zpack = pl.pallas_call(
        functools.partial(_vae_kernel, latent_dim=Z, feat_dim=D),
        out_shape=out_shape,
        in_specs=[vmem] * len(args),
        out_specs=(vmem, vmem, vmem),
        cost_estimate=pl.CostEstimate(
            flops=flops,
            transcendentals=transcendentals,
            bytes_accessed=bytes_accessed),
    )(*args)

    z = zpack[:, :Z]
    z_mean = zpack[:, Z:2 * Z]
    z_log_var = zpack[:, 2 * Z:3 * Z]

    # reshape reconstruction back to NCHW to match PyTorch output convention
    x_mean = x_mean.reshape(x_nchw.shape)
    x_var = x_var.reshape(x_nchw.shape)
    return x_mean, x_var, z, z_mean, z_log_var


def init_params(key, D, H, Z):
    ks = jax.random.split(key, 6)
    s = 0.05
    return {
        # encoder
        "we1": s * jax.random.normal(ks[0], (D, H), jnp.float32),
        "be1": jnp.zeros((1, H), jnp.float32),
        "wem": s * jax.random.normal(ks[1], (H, Z), jnp.float32),
        "bem": jnp.zeros((1, Z), jnp.float32),
        "wev": s * jax.random.normal(ks[2], (H, Z), jnp.float32),
        "bev": jnp.zeros((1, Z), jnp.float32),
        # decoder
        "wd1": s * jax.random.normal(ks[3], (Z, H), jnp.float32),
        "bd1": jnp.zeros((1, H), jnp.float32),
        "wdm": s * jax.random.normal(ks[4], (H, D), jnp.float32),
        "bdm": jnp.zeros((1, D), jnp.float32),
        "wdv": s * jax.random.normal(ks[5], (H, D), jnp.float32),
        "bdv": jnp.zeros((1, D), jnp.float32),
    }


def _reference(x_nchw, eps, p):
    # pure-JAX f32 reference for correctness checking
    B = x_nchw.shape[0]
    x = x_nchw.reshape(B, -1)
    h = jnp.tanh(x @ p["we1"] + p["be1"])
    z_mean = h @ p["wem"] + p["bem"]
    z_log_var = h @ p["wev"] + p["bev"]
    z = z_mean + jnp.exp(0.5 * z_log_var) * eps
    hd = jnp.tanh(z @ p["wd1"] + p["bd1"])
    x_mean = jax.nn.sigmoid(hd @ p["wdm"] + p["bdm"]).reshape(x_nchw.shape)
    x_var = jnp.exp(hd @ p["wdv"] + p["bdv"]).reshape(x_nchw.shape)
    return x_mean, x_var, z, z_mean, z_log_var


if __name__ == "__main__":
    key = jax.random.PRNGKey(0)
    k_x, k_eps, k_p = jax.random.split(key, 3)

    B, C, Hs, Ws = 2, 4, 16, 16      # input image shape (NCHW)
    D = C * Hs * Ws                  # 1024 flattened features
    H, Z = 128, 32                   # hidden width, latent dim

    x = jax.random.normal(k_x, (B, C, Hs, Ws), jnp.float32)
    eps = jax.random.normal(k_eps, (B, Z), jnp.float32)
    params = init_params(k_p, D, H, Z)

    # One-time weight prep (cast/fuse) — hoisted out of the per-step forward.
    prep = jax.tree_util.tree_map(jnp.asarray, prepare_params(params))
    prep = jax.block_until_ready(prep)

    outs = vae_forward(x, eps, prep)
    outs = jax.block_until_ready(outs)

    refs = _reference(x, eps, params)
    # bf16 weights through matmul layers -> loosened absolute tolerance vs f32 ref;
    # x_var goes through exp(), so additionally check relative error.
    names = ["x_mean", "x_var", "z", "z_mean", "z_log_var"]
    for name, o, r in zip(names, outs, refs):
        assert o.shape == r.shape, (name, o.shape, r.shape)
        abs_err = float(jnp.max(jnp.abs(o - r)))
        if name == "x_var":
            rel_err = float(jnp.max(jnp.abs(o - r) / (jnp.abs(r) + 1e-6)))
            assert rel_err < 5e-2, (name, rel_err)
        else:
            assert abs_err < 5e-2, (name, abs_err)

    print("KERNEL_OK")
</pallas_src>

<mosaic_0001>
module attributes {stable_mosaic.version = 11 : i64} {
  func.func @_vae_kernel(%arg0: memref<2x1024xf32, #tpu.memory_space<vmem>>, %arg1: memref<2x32xf32, #tpu.memory_space<vmem>>, %arg2: memref<1024x128xbf16, #tpu.memory_space<vmem>>, %arg3: memref<1x128xf32, #tpu.memory_space<vmem>>, %arg4: memref<128x64xf32, #tpu.memory_space<vmem>>, %arg5: memref<1x64xf32, #tpu.memory_space<vmem>>, %arg6: memref<32x128xbf16, #tpu.memory_space<vmem>>, %arg7: memref<1x128xf32, #tpu.memory_space<vmem>>, %arg8: memref<128x2048xbf16, #tpu.memory_space<vmem>>, %arg9: memref<1x2048xf32, #tpu.memory_space<vmem>>, %arg10: memref<2x1024xf32, #tpu.memory_space<vmem>>, %arg11: memref<2x1024xf32, #tpu.memory_space<vmem>>, %arg12: memref<2x128xf32, #tpu.memory_space<vmem>>) attributes {dimension_semantics = [], scalar_prefetch = 0 : i64, scratch_operands = 0 : i64, tpu.core_type = #tpu.core_type<tc>} {
    %c0 = arith.constant 0 : index
    %c0_0 = arith.constant 0 : index
    %0 = vector.load %arg0[%c0, %c0_0] : memref<2x1024xf32, #tpu.memory_space<vmem>>, vector<2x1024xf32>
    %c0_1 = arith.constant 0 : index
    %c0_2 = arith.constant 0 : index
    %1 = vector.load %arg1[%c0_1, %c0_2] : memref<2x32xf32, #tpu.memory_space<vmem>>, vector<2x32xf32>
    %2 = arith.truncf %0 : vector<2x1024xf32> to vector<2x1024xbf16>
    %c0_3 = arith.constant 0 : index
    %c0_4 = arith.constant 0 : index
    %3 = vector.load %arg2[%c0_3, %c0_4] : memref<1024x128xbf16, #tpu.memory_space<vmem>>, vector<1024x128xbf16>
    %cst = arith.constant dense<0.000000e+00> : vector<2x128xf32>
    %4 = tpu.matmul %2, %3, %cst {dimension_numbers = #tpu.dot_dimension_numbers<[1], [0], [0], [1], [0, 0, 1, 1], [], []>} : vector<2x1024xbf16>, vector<1024x128xbf16>, vector<2x128xf32> -> vector<2x128xf32>
    %c0_5 = arith.constant 0 : index
    %c0_6 = arith.constant 0 : index
    %5 = vector.load %arg3[%c0_5, %c0_6] : memref<1x128xf32, #tpu.memory_space<vmem>>, vector<1x128xf32>
    %6 = vector.broadcast %5 : vector<1x128xf32> to vector<2x128xf32>
    %7 = arith.addf %4, %6 : vector<2x128xf32>
    %8 = math.tanh %7 : vector<2x128xf32>
    %c0_7 = arith.constant 0 : index
    %c0_8 = arith.constant 0 : index
    %9 = vector.load %arg4[%c0_7, %c0_8] : memref<128x64xf32, #tpu.memory_space<vmem>>, vector<128x64xf32>
    %cst_9 = arith.constant dense<0.000000e+00> : vector<2x64xf32>
    %10 = tpu.matmul %8, %9, %cst_9 {dimension_numbers = #tpu.dot_dimension_numbers<[1], [0], [0], [1], [0, 0, 1, 1], [], []>} : vector<2x128xf32>, vector<128x64xf32>, vector<2x64xf32> -> vector<2x64xf32>
    %c0_10 = arith.constant 0 : index
    %c0_11 = arith.constant 0 : index
    %11 = vector.load %arg5[%c0_10, %c0_11] : memref<1x64xf32, #tpu.memory_space<vmem>>, vector<1x64xf32>
    %12 = vector.broadcast %11 : vector<1x64xf32> to vector<2x64xf32>
    %13 = arith.addf %10, %12 : vector<2x64xf32>
    %14 = vector.extract_strided_slice %13 {offsets = [0, 0], sizes = [2, 32], strides = [1, 1]} : vector<2x64xf32> to vector<2x32xf32>
    %15 = vector.extract_strided_slice %13 {offsets = [0, 32], sizes = [2, 32], strides = [1, 1]} : vector<2x64xf32> to vector<2x32xf32>
    %cst_12 = arith.constant 5.000000e-01 : f32
    %16 = vector.broadcast %cst_12 : f32 to vector<2x32xf32>
    %17 = arith.mulf %16, %15 : vector<2x32xf32>
    %18 = math.exp %17 : vector<2x32xf32>
    %19 = arith.mulf %18, %1 : vector<2x32xf32>
    %20 = arith.addf %14, %19 : vector<2x32xf32>
    %21 = arith.truncf %20 : vector<2x32xf32> to vector<2x32xbf16>
    %c0_13 = arith.constant 0 : index
    %c0_14 = arith.constant 0 : index
    %22 = vector.load %arg6[%c0_13, %c0_14] : memref<32x128xbf16, #tpu.memory_space<vmem>>, vector<32x128xbf16>
    %cst_15 = arith.constant dense<0.000000e+00> : vector<2x128xf32>
    %23 = tpu.matmul %21, %22, %cst_15 {dimension_numbers = #tpu.dot_dimension_numbers<[1], [0], [0], [1], [0, 0, 1, 1], [], []>} : vector<2x32xbf16>, vector<32x128xbf16>, vector<2x128xf32> -> vector<2x128xf32>
    %c0_16 = arith.constant 0 : index
    %c0_17 = arith.constant 0 : index
    %24 = vector.load %arg7[%c0_16, %c0_17] : memref<1x128xf32, #tpu.memory_space<vmem>>, vector<1x128xf32>
    %25 = vector.broadcast %24 : vector<1x128xf32> to vector<2x128xf32>
    %26 = arith.addf %23, %25 : vector<2x128xf32>
    %27 = math.tanh %26 : vector<2x128xf32>
    %28 = arith.truncf %27 : vector<2x128xf32> to vector<2x128xbf16>
    %c0_18 = arith.constant 0 : index
    %c0_19 = arith.constant 0 : index
    %29 = vector.load %arg8[%c0_18, %c0_19] : memref<128x2048xbf16, #tpu.memory_space<vmem>>, vector<128x2048xbf16>
    %cst_20 = arith.constant dense<0.000000e+00> : vector<2x2048xf32>
    %30 = tpu.matmul %28, %29, %cst_20 {dimension_numbers = #tpu.dot_dimension_numbers<[1], [0], [0], [1], [0, 0, 1, 1], [], []>} : vector<2x128xbf16>, vector<128x2048xbf16>, vector<2x2048xf32> -> vector<2x2048xf32>
    %c0_21 = arith.constant 0 : index
    %c0_22 = arith.constant 0 : index
    %31 = vector.load %arg9[%c0_21, %c0_22] : memref<1x2048xf32, #tpu.memory_space<vmem>>, vector<1x2048xf32>
    %32 = vector.broadcast %31 : vector<1x2048xf32> to vector<2x2048xf32>
    %33 = arith.addf %30, %32 : vector<2x2048xf32>
    %34 = vector.extract_strided_slice %33 {offsets = [0, 0], sizes = [2, 1024], strides = [1, 1]} : vector<2x2048xf32> to vector<2x1024xf32>
    %35 = arith.negf %34 : vector<2x1024xf32>
    %36 = math.exp %35 : vector<2x1024xf32>
    %cst_23 = arith.constant 1.000000e+00 : f32
    %37 = vector.broadcast %cst_23 : f32 to vector<2x1024xf32>
    %38 = arith.addf %37, %36 : vector<2x1024xf32>
    %39 = arith.divf %37, %38 : vector<2x1024xf32>
    %c0_24 = arith.constant 0 : index
    %c0_25 = arith.constant 0 : index
    %40 = vector.load %arg10[%c0_24, %c0_25] : memref<2x1024xf32, #tpu.memory_space<vmem>>, vector<2x1024xf32>
    tpu.vector_store %arg10[%c0_24, %c0_25], %39 {strides = array<i32>} : memref<2x1024xf32, #tpu.memory_space<vmem>>, vector<2x1024xf32>,
    %41 = vector.extract_strided_slice %33 {offsets = [0, 1024], sizes = [2, 1024], strides = [1, 1]} : vector<2x2048xf32> to vector<2x1024xf32>
    %42 = math.exp %41 : vector<2x1024xf32>
    %c0_26 = arith.constant 0 : index
    %c0_27 = arith.constant 0 : index
    %43 = vector.load %arg11[%c0_26, %c0_27] : memref<2x1024xf32, #tpu.memory_space<vmem>>, vector<2x1024xf32>
    tpu.vector_store %arg11[%c0_26, %c0_27], %42 {strides = array<i32>} : memref<2x1024xf32, #tpu.memory_space<vmem>>, vector<2x1024xf32>,
    %cst_28 = arith.constant 0.000000e+00 : f32
    %44 = vector.broadcast %cst_28 : f32 to vector<2x32xf32>
    %45 = tpu.concatenate %20, %13, %44 in 1 : vector<2x32xf32>, vector<2x64xf32>, vector<2x32xf32> -> vector<2x128xf32>
    %c0_29 = arith.constant 0 : index
    %c0_30 = arith.constant 0 : index
    %46 = vector.load %arg12[%c0_29, %c0_30] : memref<2x128xf32, #tpu.memory_space<vmem>>, vector<2x128xf32>
    tpu.vector_store %arg12[%c0_29, %c0_30], %45 {strides = array<i32>} : memref<2x128xf32, #tpu.memory_space<vmem>>, vector<2x128xf32>,
    return
  }
}

</mosaic_0001>

<bundles_post_ra>
// kernel: vae_forward.1
= control target key start
LH: loop header
LB: loop body
LE: loop exit
PB: predicated region body
PF: predicated region fallthrough
CT: control target
= control target key end

     0   :  { %18 = vsyncpa [#allocation3], 0  ;;  %s3142_s0 = inlined_call_operand.vmem [shape: f32[2,1024], index: 0, kind: input, shape index: {}]   ;;  %s3143_s1 = inlined_call_operand.vmem [shape: f32[2,32], index: 1, kind: input, shape index: {}]   ;;  %s3144_s2 = inlined_call_operand.hbm [shape: bf16[1024,128], index: 2, kind: input, shape index: {}]   ;;  %s3145_s3 = inlined_call_operand.vmem [shape: f32[1,128], index: 3, kind: input, shape index: {}]   ;;  %s3146_s4 = inlined_call_operand.vmem [shape: f32[128,64], index: 4, kind: input, shape index: {}]   ;;  %s3147_s5 = inlined_call_operand.vmem [shape: f32[1,64], index: 5, kind: input, shape index: {}]   ;;  %s3148_s6 = inlined_call_operand.vmem [shape: bf16[32,128], index: 6, kind: input, shape index: {}]   ;;  %s3149_s7 = inlined_call_operand.vmem [shape: f32[1,128], index: 7, kind: input, shape index: {}]   ;;  %s3150_s8 = inlined_call_operand.hbm [shape: bf16[128,2048], index: 8, kind: input, shape index: {}]   ;;  %s3151_s9 = inlined_call_operand.vmem [shape: f32[1,2048], index: 9, kind: input, shape index: {}]   ;;  %s3152_s10 = inlined_call_operand.vmem [shape: f32[2,1024], index: 10, kind: output, shape index: {0}]   ;;  %s3153_s11 = inlined_call_operand.vmem [shape: f32[2,1024], index: 11, kind: output, shape index: {1}]   ;;  %s3154_s12 = inlined_call_operand.vmem [shape: f32[2,128], index: 12, kind: output, shape index: {2}]  }
   0x1   :  { %19 = vsyncpa [#allocation5], 0  ;;  %s2870_s21 = smov [#allocation2]  }
   0x2   :  { %s29_s22 = sshll.u32 %s2870_s21, 4  ;;  %s30_s22 = int_to_ptr.vmem [resolvable:$true] %s29_s22 }
   0x3   :  { %s2834_s23 = scalar_lea.vmem %s30_s22, 8192  ;;  %p2839_p1 = scmp.lt.s32.totalorder %s30_s22, %s30_s22 }
   0x4   :  { %p2835_p0 = scmp.ne.s32.totalorder %s30_s22, %s2834_s23  ;;  %p2840_p2 = scmp.lt.s32.totalorder %s2834_s23, %s2834_s23 }
   0x6   :  { %p2841_p3 = por %p2840_p2, %p2839_p1 }
   0x8   :  { %p2842_p4 = pnand %p2841_p3, %p2835_p0 }
   0xa   :  { %2845 = shalt.err (!%p2842_p4)
}
   0xb   :  { %s2871_s24 = smov 64   ;;  %s2872_s25 = smov 4  }
   0xc   :  { %35 = dma.hbm_to_vmem [thread:$0]  %s3144_s2, 8192, %s30_s22, [#allocation3], %s2871_s24, %s2871_s24, %s2872_s25  }
   0xd   :  { %s2873_s28 = smov [#allocation4]  }
   0xe   :  { %s51_s29 = sshll.u32 %s2873_s28, 4  ;;  %s52_s29 = int_to_ptr.vmem [resolvable:$true] %s51_s29 }
   0xf   :  { %s2854_s30 = scalar_lea.vmem %s52_s29, 16384  ;;  %p2859_p6 = scmp.lt.s32.totalorder %s52_s29, %s52_s29 }
  0x10   :  { %p2855_p5 = scmp.ne.s32.totalorder %s52_s29, %s2854_s30  ;;  %p2860_p7 = scmp.lt.s32.totalorder %s2854_s30, %s2854_s30 }
  0x12   :  { %p2861_p8 = por %p2860_p7, %p2859_p6 }
  0x14   :  { %p2862_p9 = pnand %p2861_p8, %p2855_p5 }
  0x16   :  { %2865 = shalt.err (!%p2862_p9)
}
  0x17   :  { %s2874_s13 = smov 1024  }
  0x18   :  { %57 = dma.hbm_to_vmem [thread:$0]  %s3150_s8, 16384, %s52_s29, [#allocation5], %s2874_s13, %s2874_s13, %s2871_s24  }
  0x19   :  { %2866 = dma.done.wait [#allocation3], 8192  }
  0x1a   :  { %2867 = vsyncadd [#allocation3], 4294959104 }
  0x1b   :  { %2868 = dma.done.wait [#allocation5], 16384  }
  0x1c   :  { %2869 = vsyncadd [#allocation5], 4294950912  ;;  %v2704_v0 = vld [vmem:[#allocation2 + $0x78] sm:$0xff]   ;;  %v2708_v4 = vld [vmem:[#allocation2 + $0x70] sm:$0xff]   ;;  %v2875_v22 = vmov 1983009808   ;;  %v76_v24 = vlaneseq }
  0x1d   :  { %v2705_v1 = vld [vmem:[#allocation2 + $0xf8] sm:$0xff]   ;;  %2542 = vmatprep.subr.bf16.mxu0 %v2704_v0  ;;  %v2709_v5 = vld [vmem:[#allocation2 + $0xf0] sm:$0xff]   ;;  %v2712_v8 = vld [vmem:[#allocation2 + $0x68] sm:$0xff]   ;;  %v74_v23 = vunpack.c.l.s4 %v2875_v22  ;;  %vm2877_vm0 = vmmov 0   ;;  %s2878_s30 = smov 32   ;;  %vm932_vm1 = vcmask 261120  }
  0x1e   :  { %v2706_v2 = vld [vmem:[#allocation2 + $0x38] sm:$0xff]   ;;  %2564 = vmatprep.subr.bf16.mxu1 %v2705_v1  ;;  %v2710_v6 = vld [vmem:[#allocation2 + $0x30] sm:$0xff]   ;;  %v2713_v9 = vld [vmem:[#allocation2 + $0xe8] sm:$0xff]   ;;  %v2952_v30 = vshrl.u32 %v76_v24, 7  ;;  %vm2319_vm2 = vcmask 785408  }
  0x1f   :  { %v2707_v3 = vld [vmem:[#allocation2 + $0xb8] sm:$0xff]   ;;  %2543 = vmatpush3.bf16.msra.mxu0 %v2706_v2  ;;  %v2711_v7 = vld [vmem:[#allocation2 + $0xb0] sm:$0xff]   ;;  %v2714_v10 = vld [vmem:[#allocation2 + $0x28] sm:$0xff]   ;;  %v75_v29 = vunpack.c.0.s8 %v74_v23 }
  0x20   :  { %2565 = vmatpush3.bf16.msra.mxu1 %v2707_v3  ;;  %2544 = vmatprep.subr.bf16.mxu0 %v2708_v4  ;;  %v2715_v11 = vld [vmem:[#allocation2 + $0xa8] sm:$0xff]   ;;  %v2716_v12 = vld [vmem:[#allocation2 + $0x60] sm:$0xff]   ;;  %v2720_v16 = vld [vmem:[#allocation2 + $0x58] sm:$0xff]  }
  0x21   :  { %2566 = vmatprep.subr.bf16.mxu1 %v2709_v5  ;;  %v2717_v13 = vld [vmem:[#allocation2 + $0xe0] sm:$0xff]   ;;  %v2721_v17 = vld [vmem:[#allocation2 + $0xd8] sm:$0xff]   ;;  %v2724_v20 = vld [vmem:[#allocation2 + $0x50] sm:$0xff]   ;;  %v2955_v35 = vsub.s32 %v75_v29, %v2952_v30 }
  0x22   :  { %v2718_v14 = vld [vmem:[#allocation2 + $0x20] sm:$0xff]   ;;  %v2722_v18 = vld [vmem:[#allocation2 + $0x18] sm:$0xff]   ;;  %v2725_v21 = vld [vmem:[#allocation2 + $0xd0] sm:$0xff]  }
  0x23   :  { %2545 = vmatpush3.bf16.msra.mxu0 %v2710_v6  ;;  %v2719_v15 = vld [vmem:[#allocation2 + $0xa0] sm:$0xff]   ;;  %v2723_v19 = vld [vmem:[#allocation2 + $0x98] sm:$0xff]   ;;  %v2726_v25 = vld [vmem:[#allocation2 + $0x10] sm:$0xff]  }
  0x24   :  { %2567 = vmatpush3.bf16.msra.mxu1 %v2711_v7  ;;  %2546 = vmatprep.subr.bf16.mxu0 %v2712_v8  ;;  %v2727_v26 = vld [vmem:[#allocation2 + $0x90] sm:$0xff]   ;;  %v2728_v27 = vld [vmem:[#allocation2 + $0x48] sm:$0xff]   ;;  %v2732_v33 = vld [vmem:[#allocation2 + $0x40] sm:$0xff]  }
  0x25   :  { %2568 = vmatprep.subr.bf16.mxu1 %v2713_v9  ;;  %v2729_v28 = vld [vmem:[#allocation2 + $0xc8] sm:$0xff]   ;;  %v2733_v34 = vld [vmem:[#allocation2 + $0xc0] sm:$0xff]   ;;  %v2737_v41 = vld [vmem:[#allocation2 + $0x178] sm:$0xff]  }
  0x26   :  { %v2730_v31 = vld [vmem:[#allocation2 + $0x8] sm:$0xff]   ;;  %v2734_v36 = vld [vmem:[#allocation2] sm:$0xff]   ;;  %v2738_v42 = vld [vmem:[#allocation2 + $0x1f8] sm:$0xff]  }
  0x27   :  { %2547 = vmatpush3.bf16.msra.mxu0 %v2714_v10  ;;  %v2731_v32 = vld [vmem:[#allocation2 + $0x88] sm:$0xff]   ;;  %v2735_v37 = vld [vmem:[#allocation2 + $0x80] sm:$0xff]   ;;  %v2739_v46 = vld [vmem:[#allocation2 + $0x138] sm:$0xff]  }
  0x28   :  { %2569 = vmatpush3.bf16.msra.mxu1 %v2715_v11  ;;  %2548 = vmatprep.subr.bf16.mxu0 %v2716_v12  ;;  %v67_v38 = vld [vmem:[%s3142_s0] sm:$0xff]  ;;  %v2740_v49 = vld [vmem:[#allocation2 + $0x1b8] sm:$0xff]   ;;  %v2741_v51 = vld [vmem:[#allocation2 + $0x170] sm:$0xff]  }
  0x29   :  { %2570 = vmatprep.subr.bf16.mxu1 %v2717_v13  ;;  %v79_v39 = vrot.slane %v67_v38, %v2955_v35  ;;  %v72_v40 = vcombine.high %v67_v38, %v67_v38  ;;  %v2742_v53 = vld [vmem:[#allocation2 + $0x1f0] sm:$0xff]   ;;  %v2745_v56 = vld [vmem:[#allocation2 + $0x168] sm:$0xff]   ;;  %v2749_v60 = vld [vmem:[#allocation2 + $0x160] sm:$0xff]  }
  0x2a   :  { %v2743_v54 = vld [vmem:[#allocation2 + $0x130] sm:$0xff]   ;;  %v2746_v57 = vld [vmem:[#allocation2 + $0x1e8] sm:$0xff]   ;;  %v2750_v61 = vld [vmem:[#allocation2 + $0x1e0] sm:$0xff]  }
  0x2b   :  { %2549 = vmatpush3.bf16.msra.mxu0 %v2718_v14  ;;  %v87_v43 = vcombine.high %v79_v39, %v79_v39  ;;  %v86_v44 = vrot.slane %v72_v40, %v2955_v35  ;;  %v114_v45 = vpack.c.bf16 %v79_v39, %v79_v39  ;;  %v2744_v55 = vld [vmem:[#allocation2 + $0x1b0] sm:$0xff]   ;;  %v2747_v58 = vld [vmem:[#allocation2 + $0x128] sm:$0xff]   ;;  %v2751_v62 = vld [vmem:[#allocation2 + $0x120] sm:$0xff]  }
  0x2c   :  { %2571 = vmatpush3.bf16.msra.mxu1 %v2719_v15  ;;  %2550 = vmatprep.subr.bf16.mxu0 %v2720_v16  ;;  %v2748_v59 = vld [vmem:[#allocation2 + $0x1a8] sm:$0xff]   ;;  %v2752_v63 = vld [vmem:[#allocation2 + $0x1a0] sm:$0xff]   ;;  %v2753_v0 = vld [vmem:[#allocation2 + $0x158] sm:$0xff]  }
  0x2d   :  { %2572 = vmatprep.subr.bf16.mxu1 %v2721_v17  ;;  %v115_v47 = vpack.c.bf16 %v87_v43, %v87_v43  ;;  %v88_v48 = vcombine.high %v86_v44, %v86_v44  ;;  %v116_v50 = vpack.c.bf16 %v86_v44, %v86_v44  ;;  %v2754_v1 = vld [vmem:[#allocation2 + $0x1d8] sm:$0xff]   ;;  %v2757_v4 = vld [vmem:[#allocation2 + $0x150] sm:$0xff]   ;;  %v2761_v8 = vld [vmem:[#allocation2 + $0x148] sm:$0xff]  }
  0x2e   :  { %v2755_v2 = vld [vmem:[#allocation2 + $0x118] sm:$0xff]   ;;  %v2758_v5 = vld [vmem:[#allocation2 + $0x1d0] sm:$0xff]   ;;  %v2762_v9 = vld [vmem:[#allocation2 + $0x1c8] sm:$0xff]  }
  0x2f   :  { %2551 = vmatpush3.bf16.msra.mxu0 %v2722_v18  ;;  %673 = vmatprep.mubr.bf16.mxu0 %v115_v47  ;;  %v117_v52 = vpack.c.bf16 %v88_v48, %v88_v48  ;;  %v2756_v3 = vld [vmem:[#allocation2 + $0x198] sm:$0xff]   ;;  %v2759_v6 = vld [vmem:[#allocation2 + $0x110] sm:$0xff]   ;;  %v2763_v10 = vld [vmem:[#allocation2 + $0x108] sm:$0xff]  }
  0x30   :  { %2573 = vmatpush3.bf16.msra.mxu1 %v2723_v19  ;;  %2552 = vmatprep.subr.bf16.mxu0 %v2724_v20  ;;  %v2760_v7 = vld [vmem:[#allocation2 + $0x190] sm:$0xff]   ;;  %v2764_v11 = vld [vmem:[#allocation2 + $0x188] sm:$0xff]   ;;  %v2765_v12 = vld [vmem:[#allocation2 + $0x140] sm:$0xff]  }
  0x31   :  { %2574 = vmatprep.subr.bf16.mxu1 %v2725_v21  ;;  %713 = vmatprep.mubr.bf16.mxu1 %v117_v52  ;;  %v2766_v13 = vld [vmem:[#allocation2 + $0x1c0] sm:$0xff]   ;;  %v68_v15 = vld [vmem:[%s3142_s0 + $0x8] sm:$0xff]  ;;  %v808_v38 = vld [vmem:[%s3146_s4 + $0x30] sm:$0xff] }
  0x32   :  { %v2767_v14 = vld [vmem:[#allocation2 + $0x100] sm:$0xff]   ;;  %v96_v16 = vrot.slane %v68_v15, %v2955_v35  ;;  %v89_v17 = vcombine.high %v68_v15, %v68_v15  ;;  %v815_v29 = vld [vmem:[%s3146_s4 + $0x68] sm:$0xff] }
  0x33   :  { %2553 = vmatpush3.bf16.msra.mxu0 %v2726_v25  ;;  %v2768_v18 = vld [vmem:[#allocation2 + $0x180] sm:$0xff]   ;;  %v807_v39 = vld [vmem:[%s3146_s4 + $0x28] sm:$0xff] }
  0x34   :  { %2575 = vmatpush3.bf16.msra.mxu1 %v2727_v26  ;;  %2554 = vmatprep.subr.bf16.mxu0 %v2728_v27  ;;  %v104_v19 = vcombine.high %v96_v16, %v96_v16  ;;  %v103_v20 = vrot.slane %v89_v17, %v2955_v35  ;;  %v118_v21 = vpack.c.bf16 %v96_v16, %v96_v16  ;;  %v817_v26 = vld [vmem:[%s3146_s4 + $0x78] sm:$0xff]  ;;  %v2876_v27 = vmov 0.0   ;;  %v806_v40 = vld [vmem:[%s3146_s4 + $0x20] sm:$0xff]  ;;  %v803_v43 = vld [vmem:[%s3146_s4 + $0x8] sm:$0xff] }
  0x35   :  { %2576 = vmatprep.subr.bf16.mxu1 %v2729_v28  ;;  %v816_v28 = vld [vmem:[%s3146_s4 + $0x70] sm:$0xff]  ;;  %v802_v44 = vld [vmem:[%s3146_s4] sm:$0xff] }
  0x36   :  { %v119_v22 = vpack.c.bf16 %v104_v19, %v104_v19  ;;  %v105_v23 = vcombine.high %v103_v20, %v103_v20  ;;  %v120_v24 = vpack.c.bf16 %v103_v20, %v103_v20  ;;  %v2771_v15 = vld [vmem:[%s3148_s6] sm:$0xff]  }
  0x37   :  { %2555 = vmatpush3.bf16.msra.mxu0 %v2730_v31  ;;  %v814_v31 = vld [vmem:[%s3146_s4 + $0x60] sm:$0xff] }
  0x38   :  { %2577 = vmatpush3.bf16.msra.mxu1 %v2731_v32  ;;  %2556 = vmatprep.subr.bf16.mxu0 %v2732_v33  ;;  %v121_v25 = vpack.c.bf16 %v105_v23, %v105_v23  ;;  %v813_v32 = vld [vmem:[%s3146_s4 + $0x58] sm:$0xff]  ;;  %v812_v33 = vld [vmem:[%s3146_s4 + $0x50] sm:$0xff]  ;;  %v1090_v16 = vld [vmem:[#allocation4 + $0x380] sm:$0xff] }
  0x39   :  { %2578 = vmatprep.subr.bf16.mxu1 %v2733_v34  ;;  %v811_v34 = vld [vmem:[%s3146_s4 + $0x48] sm:$0xff]  ;;  %v1098_v17 = vld [vmem:[#allocation4 + $0x3c0] sm:$0xff] }
  0x3a   :  { %v2518_v19 = vcombine.low %v1090_v16, %v1098_v17  ;;  %v2519_v20 = vcombine.high %v1090_v16, %v1098_v17 }
  0x3b   :  { %2557 = vmatpush3.bf16.msra.mxu0 %v2734_v36  ;;  %v810_v36 = vld [vmem:[%s3146_s4 + $0x40] sm:$0xff] }
  0x3c   :  { %2579 = vmatpush3.bf16.msra.mxu1 %v2735_v37  ;;  %2586 = vmatprep.subr.bf16.mxu0 %v2737_v41  ;;  %v809_v37 = vld [vmem:[%s3146_s4 + $0x38] sm:$0xff] }
  0x3d   :  { %2608 = vmatprep.subr.bf16.mxu1 %v2738_v42  ;;  %v805_v41 = vld [vmem:[%s3146_s4 + $0x18] sm:$0xff]  ;;  %v804_v42 = vld [vmem:[%s3146_s4 + $0x10] sm:$0xff] }
  0x3e   :  { %674 = vmatmul.mubr.bf16.vlgmr.msra.gmra.mxu0 %v114_v45  ;;  %v69_v45 = vld [vmem:[%s3143_s1] sm:$0x3] }
  0x3f   :  { %2587 = vmatpush3.bf16.msra.mxu0 %v2739_v46  ;;  %714 = vmatmul.mubr.bf16.vlgmr.msra.gmra.mxu1 %v116_v50 }
  0x40   :  { %2588 = vmatprep.subr.bf16.mxu0 %v2741_v51  ;;  %2609 = vmatpush3.bf16.msra.mxu1 %v2740_v49 }
  0x41   :  { %2610 = vmatprep.subr.bf16.mxu1 %v2742_v53  ;;  %753 = vmatprep.mubr.bf16.mxu0 %v119_v22 }
  0x42   :  { %793 = vmatprep.mubr.bf16.mxu1 %v121_v25  ;;  %899 = vrot.lane.b32.xlu0 %v69_v45, %s2878_s30  ;;  %v1083_v25 = vld [vmem:[#allocation4 + $0x348] sm:$0xff] }
  0x43   :  { %2589 = vmatpush3.bf16.msra.mxu0 %v2743_v54 }
  0x44   :  { %2590 = vmatprep.subr.bf16.mxu0 %v2745_v56  ;;  %2611 = vmatpush3.bf16.msra.mxu1 %v2744_v55  ;;  %v2336_v55 = vld [vmem:[%s3145_s3] ss:$0 sm:$0xff] }
  0x45   :  { %2612 = vmatprep.subr.bf16.mxu1 %v2746_v57 }
  0x47   :  { %2591 = vmatpush3.bf16.msra.mxu0 %v2747_v58 }
  0x48   :  { %2592 = vmatprep.subr.bf16.mxu0 %v2749_v60  ;;  %2613 = vmatpush3.bf16.msra.mxu1 %v2748_v59 }
  0x49   :  { %2614 = vmatprep.subr.bf16.mxu1 %v2750_v61 }
  0x4b   :  { %2593 = vmatpush3.bf16.msra.mxu0 %v2751_v62 }
  0x4c   :  { %2594 = vmatprep.subr.bf16.mxu0 %v2753_v0  ;;  %2615 = vmatpush3.bf16.msra.mxu1 %v2752_v63 }
  0x4d   :  { %2616 = vmatprep.subr.bf16.mxu1 %v2754_v1 }
  0x4f   :  { %2595 = vmatpush3.bf16.msra.mxu0 %v2755_v2 }
  0x50   :  { %2596 = vmatprep.subr.bf16.mxu0 %v2757_v4  ;;  %2617 = vmatpush3.bf16.msra.mxu1 %v2756_v3 }
  0x51   :  { %2618 = vmatprep.subr.bf16.mxu1 %v2758_v5 }
  0x53   :  { %2597 = vmatpush3.bf16.msra.mxu0 %v2759_v6 }
  0x54   :  { %2598 = vmatprep.subr.bf16.mxu0 %v2761_v8  ;;  %2619 = vmatpush3.bf16.msra.mxu1 %v2760_v7  ;;  %v2770_v8 = vld [vmem:[%s3148_s6 + $0x8] sm:$0xff]  }
  0x55   :  { %2620 = vmatprep.subr.bf16.mxu1 %v2762_v9  ;;  %v2401_v9 = vld [vmem:[%s3147_s5] ss:$0 sm:$0xff]  ;;  %s2879_s5 = smov 96  }
  0x57   :  { %2599 = vmatpush3.bf16.msra.mxu0 %v2763_v10 }
  0x58   :  { %2600 = vmatprep.subr.bf16.mxu0 %v2765_v12  ;;  %2621 = vmatpush3.bf16.msra.mxu1 %v2764_v11 }
  0x59   :  { %2622 = vmatprep.subr.bf16.mxu1 %v2766_v13 }
  0x5b   :  { %2601 = vmatpush3.bf16.msra.mxu0 %v2767_v14 }
  0x5c   :  { %2623 = vmatpush3.bf16.msra.mxu1 %v2768_v18  ;;  %2650 = vmatprep.subr.mxu0 %v2876_v27  ;;  %v1091_v18 = vld [vmem:[#allocation4 + $0x388] sm:$0xff] }
  0x5d   :  { %2685 = vmatprep.subr.bf16.mxu1 %v2876_v27 }
  0x5e   :  { %754 = vmatmul.mubr.bf16.vlgmr.msra.gmra.mxu0 %v118_v21  ;;  %v1099_v21 = vld [vmem:[#allocation4 + $0x3c8] sm:$0xff] }
  0x5f   :  { %794 = vmatmul.mubr.bf16.vlgmr.msra.gmra.mxu1 %v120_v24  ;;  %2651 = vmatpush3.msra.mxu0 %v817_v26  ;;  %v2520_v22 = vcombine.low %v1091_v18, %v1099_v21  ;;  %v2521_v23 = vcombine.high %v1091_v18, %v1099_v21  ;;  %v1075_v24 = vld [vmem:[#allocation4 + $0x308] sm:$0xff] }
  0x60   :  { %2652 = vmatprep.subr.mxu0 %v2876_v27  ;;  %2682 = vmatprep.mubr.msk.f32.mxu0 %vm2877_vm0, %v2876_v27  ;;  %v2505_v26 = vcombine.high %v1075_v24, %v1083_v25  ;;  %v979_v21 = vld [vmem:[#allocation4 + $0x8] sm:$0xff] }
  0x61   :  { %2653 = vmatpush3.msra.mxu0 %v816_v28  ;;  %2689 = vmatprep.mubr.msk.bf16.mxu1 %vm2877_vm0, %v2876_v27  ;;  %v2504_v28 = vcombine.low %v1075_v24, %v1083_v25 }
  0x62   :  { %2654 = vmatprep.subr.mxu0 %v2876_v27  ;;  %2686 = vmatpush3.bf16.msra.mxu1 %v2770_v8 }
  0x63   :  { %2655 = vmatpush3.msra.mxu0 %v815_v29  ;;  %2687 = vmatprep.subr.bf16.mxu1 %v2876_v27 }
  0x64   :  { %2656 = vmatprep.subr.mxu0 %v2876_v27 }
  0x65   :  { %2657 = vmatpush3.msra.mxu0 %v814_v31  ;;  %v1059_v31 = vld [vmem:[#allocation4 + $0x288] sm:$0xff] }
  0x66   :  { %2658 = vmatprep.subr.mxu0 %v2876_v27  ;;  %2688 = vmatpush3.bf16.msra.mxu1 %v2771_v15  ;;  %v1003_v15 = vld [vmem:[#allocation4 + $0xc8] sm:$0xff] }
  0x67   :  { %2659 = vmatpush3.msra.mxu0 %v813_v32  ;;  %1830 = vmatprep.subr.bf16.mxu1 %v2519_v20  ;;  %v1067_v32 = vld [vmem:[#allocation4 + $0x2c8] sm:$0xff]  ;;  %v986_v20 = vld [vmem:[#allocation4 + $0x40] sm:$0xff] }
  0x68   :  { %2660 = vmatprep.subr.mxu0 %v2876_v27 }
  0x69   :  { %2661 = vmatpush3.msra.mxu0 %v812_v33 }
  0x6a   :  { %2662 = vmatprep.subr.mxu0 %v2876_v27 }
  0x6b   :  { %2663 = vmatpush3.msra.mxu0 %v811_v34  ;;  %v2489_v34 = vcombine.high %v1059_v31, %v1067_v32 }
  0x6c   :  { %2664 = vmatprep.subr.mxu0 %v2876_v27 }
  0x6d   :  { %2665 = vmatpush3.msra.mxu0 %v810_v36  ;;  %v2488_v36 = vcombine.low %v1059_v31, %v1067_v32  ;;  %v2880_v31 = vmov 0  }
  0x6e   :  { %2666 = vmatprep.subr.mxu0 %v2876_v27 }
  0x6f   :  { %2667 = vmatpush3.msra.mxu0 %v809_v37  ;;  %v1043_v37 = vld [vmem:[#allocation4 + $0x208] sm:$0xff] }
  0x70   :  { %2668 = vmatprep.subr.mxu0 %v2876_v27 }
  0x71   :  { %2669 = vmatpush3.msra.mxu0 %v808_v38  ;;  %v1051_v38 = vld [vmem:[#allocation4 + $0x248] sm:$0xff] }
  0x72   :  { %2670 = vmatprep.subr.mxu0 %v2876_v27 }
  0x73   :  { %2671 = vmatpush3.msra.mxu0 %v807_v39  ;;  %v2473_v39 = vcombine.high %v1043_v37, %v1051_v38 }
  0x74   :  { %2672 = vmatprep.subr.mxu0 %v2876_v27 }
  0x75   :  { %2673 = vmatpush3.msra.mxu0 %v806_v40  ;;  %v2472_v40 = vcombine.low %v1043_v37, %v1051_v38  ;;  %v2402_v38 = vld [vmem:[%s3149_s7] ss:$0 sm:$0xff] }
  0x76   :  { %2674 = vmatprep.subr.mxu0 %v2876_v27 }
  0x77   :  { %2675 = vmatpush3.msra.mxu0 %v805_v41 }
  0x78   :  { %2676 = vmatprep.subr.mxu0 %v2876_v27 }
  0x79   :  { %2677 = vmatpush3.msra.mxu0 %v804_v42  ;;  %v1074_v42 = vld [vmem:[#allocation4 + $0x300] sm:$0xff] }
  0x7a   :  { %2678 = vmatprep.subr.mxu0 %v2876_v27 }
  0x7b   :  { %2679 = vmatpush3.msra.mxu0 %v803_v43  ;;  %v1082_v43 = vld [vmem:[#allocation4 + $0x340] sm:$0xff] }
  0x7c   :  { %2680 = vmatprep.subr.mxu0 %v2876_v27 }
  0x7d   :  { %2681 = vmatpush3.msra.mxu0 %v802_v44 }
  0x7e   :  { %1871 = vmatprep.subr.bf16.mxu0 %v2521_v23  ;;  %v987_v23 = vld [vmem:[#allocation4 + $0x48] sm:$0xff] }
  0x7f   :  { %v2408_v25 = vcombine.low %v979_v21, %v987_v23 }
  0xb4   :  { %v900_v27 = vpop.permute.xlu0 %899 }
  0xfe   :  { %v2558_v46 = vpop.f32.mrf.mxu0 }
  0xff   :  { %v2580_v47 = vpop.f32.mrf.mxu1 }
 0x100   :  { %v2559_v48 = vpop.f32.mrf.mxu0 }
 0x101   :  { %v2581_v49 = vpop.f32.mrf.mxu1  ;;  %v2560_v54 = vadd.f32 %v2559_v48, %v2558_v46  ;;  %v2503_v48 = vcombine.high %v1074_v42, %v1082_v43 }
 0x102   :  { %v2561_v50 = vpop.f32.mrf.mxu0  ;;  %v2582_v57 = vadd.f32 %v2581_v49, %v2580_v47 }
 0x103   :  { %v2583_v51 = vpop.f32.mrf.mxu1  ;;  %v676_v56 = vadd.f32 %v2560_v54, %v2336_v55  ;;  %v1058_v50 = vld [vmem:[#allocation4 + $0x280] sm:$0xff] }
 0x104   :  { %v2562_v52 = vpop.f32.mrf.mxu0  ;;  %v1066_v51 = vld [vmem:[#allocation4 + $0x2c0] sm:$0xff] }
 0x105   :  { %v2584_v53 = vpop.f32.mrf.mxu1  ;;  %v716_v61 = vadd.f32 %v2582_v57, %v676_v56  ;;  %v2502_v52 = vcombine.low %v1074_v42, %v1082_v43  ;;  %v1042_v54 = vld [vmem:[#allocation4 + $0x200] sm:$0xff]  ;;  %v2486_v56 = vcombine.low %v1058_v50, %v1066_v51 }
 0x106   :  { %v2487_v53 = vcombine.high %v1058_v50, %v1066_v51  ;;  %v1050_v55 = vld [vmem:[#allocation4 + $0x240] sm:$0xff] }
 0x107   :  { %v2471_v57 = vcombine.high %v1042_v54, %v1050_v55 }
 0x11e   :  { %v2602_v58 = vpop.f32.mrf.mxu0 }
 0x11f   :  { %v2624_v59 = vpop.f32.mrf.mxu1 }
 0x120   :  { %v2603_v60 = vpop.f32.mrf.mxu0 }
 0x121   :  { %v2604_v62 = vadd.f32 %v2603_v60, %v2602_v58  ;;  %v2625_v63 = vpop.f32.mrf.mxu1  ;;  %v2470_v58 = vcombine.low %v1042_v54, %v1050_v55  ;;  %v1034_v60 = vld [vmem:[#allocation4 + $0x1c0] sm:$0xff]  ;;  %v1061_v54 = vld [vmem:[#allocation4 + $0x298] sm:$0xff] }
 0x122   :  { %v2605_v0 = vpop.f32.mrf.mxu0  ;;  %v2626_v2 = vadd.f32 %v2625_v63, %v2624_v59  ;;  %v1026_v59 = vld [vmem:[#allocation4 + $0x180] sm:$0xff]  ;;  %v1035_v63 = vld [vmem:[#allocation4 + $0x1c8] sm:$0xff]  ;;  %v1069_v55 = vld [vmem:[#allocation4 + $0x2d8] sm:$0xff] }
 0x123   :  { %v756_v1 = vadd.f32 %v2604_v62, %v716_v61  ;;  %v2627_v3 = vpop.f32.mrf.mxu1  ;;  %v1027_v61 = vld [vmem:[#allocation4 + $0x188] sm:$0xff]  ;;  %v2455_v62 = vcombine.high %v1026_v59, %v1034_v60  ;;  %v2454_v0 = vcombine.low %v1026_v59, %v1034_v60  ;;  %v2493_v59 = vcombine.high %v1061_v54, %v1069_v55  ;;  %v1044_v60 = vld [vmem:[#allocation4 + $0x210] sm:$0xff] }
 0x124   :  { %v2606_v4 = vpop.f32.mrf.mxu0  ;;  %v1010_v3 = vld [vmem:[#allocation4 + $0x100] sm:$0xff] }
 0x125   :  { %v796_v5 = vadd.f32 %v2626_v2, %v756_v1  ;;  %v2628_v6 = vpop.f32.mrf.mxu1  ;;  %v2456_v1 = vcombine.low %v1027_v61, %v1035_v63  ;;  %v2457_v2 = vcombine.high %v1027_v61, %v1035_v63  ;;  %v1018_v4 = vld [vmem:[#allocation4 + $0x140] sm:$0xff]  ;;  %v1052_v61 = vld [vmem:[#allocation4 + $0x250] sm:$0xff]  ;;  %v1053_v63 = vld [vmem:[#allocation4 + $0x258] sm:$0xff] }
 0x126   :  { %v2439_v6 = vcombine.high %v1010_v3, %v1018_v4  ;;  %v2438_v8 = vcombine.low %v1010_v3, %v1018_v4  ;;  %v1028_v4 = vld [vmem:[#allocation4 + $0x190] sm:$0xff] }
 0x127   :  { %2772 = vtanh.f32 %v796_v5  ;;  %v1011_v5 = vld [vmem:[#allocation4 + $0x108] sm:$0xff] }
 0x134   :  { %v2773_v7 = vpop.eup %2772 }
 0x135   :  { %2683 = vmatmul.mubr.f32.vlgmr.msra.gmra.mxu0 %v2773_v7  ;;  %v1019_v7 = vld [vmem:[#allocation4 + $0x148] sm:$0xff] }
 0x136   :  { %1872 = vmatpush1.bf16.msra.mxu0 %v2520_v22  ;;  %1903 = vmatprep.mubr.bf16.mxu0 %v2880_v31 }
 0x137   :  { %1873 = vmatprep.subr.bf16.mxu0 %v2505_v26  ;;  %v2409_v26 = vcombine.high %v979_v21, %v987_v23  ;;  %v1004_v21 = vld [vmem:[#allocation4 + $0xd0] sm:$0xff]  ;;  %v1005_v23 = vld [vmem:[#allocation4 + $0xd8] sm:$0xff] }
 0x13a   :  { %1874 = vmatpush1.bf16.msra.mxu0 %v2504_v28  ;;  %v1100_v28 = vld [vmem:[#allocation4 + $0x3d0] sm:$0xff] }
 0x13b   :  { %1875 = vmatprep.subr.bf16.mxu0 %v2489_v34  ;;  %v1101_v34 = vld [vmem:[#allocation4 + $0x3d8] sm:$0xff] }
 0x13e   :  { %1876 = vmatpush1.bf16.msra.mxu0 %v2488_v36 }
 0x13f   :  { %1877 = vmatprep.subr.bf16.mxu0 %v2473_v39 }
 0x142   :  { %1878 = vmatpush1.bf16.msra.mxu0 %v2472_v40 }
 0x143   :  { %1879 = vmatprep.subr.bf16.mxu0 %v2457_v2  ;;  %v2475_v2 = vcombine.high %v1044_v60, %v1052_v61 }
 0x146   :  { %1880 = vmatpush1.bf16.msra.mxu0 %v2456_v1  ;;  %v2492_v1 = vcombine.low %v1061_v54, %v1069_v55 }
 0x1f5   :  { %v891_v10 = vpop.f32.mrf.mxu0 }
 0x1f6   :  { %v892_v11 = vadd.f32 %v2401_v9, %v891_v10  ;;  %v2440_v9 = vcombine.low %v1011_v5, %v1019_v7  ;;  %v2441_v10 = vcombine.high %v1011_v5, %v1019_v7  ;;  %v1036_v5 = vld [vmem:[#allocation4 + $0x1d0] sm:$0xff]  ;;  %v1037_v7 = vld [vmem:[#allocation4 + $0x1d8] sm:$0xff] }
 0x1f7   :  { %v2684_v12 = vpop.f32.mrf.mxu0 }
 0x1f8   :  { %v895_v13 = vmul.f32 0.5, %v892_v11  ;;  %2315 = vrot.lane.b32.xlu1 %v892_v11, %s2878_s30  ;;  %1881 = vmatprep.subr.bf16.mxu0 %v2441_v10  ;;  %v1002_v12 = vld [vmem:[#allocation4 + $0xc0] sm:$0xff]  ;;  %v2459_v10 = vcombine.high %v1028_v4, %v1036_v5 }
 0x1f9   :  { %1882 = vmatpush1.bf16.msra.mxu0 %v2440_v9 }
 0x1fa   :  { %v896_v14 = vmul.f32 1.442695, %v895_v13  ;;  %v995_v13 = vld [vmem:[#allocation4 + $0x88] sm:$0xff] }
 0x1fb   :  { %v2424_v17 = vcombine.low %v995_v13, %v1003_v15  ;;  %v2425_v18 = vcombine.high %v995_v13, %v1003_v15  ;;  %v1020_v13 = vld [vmem:[#allocation4 + $0x150] sm:$0xff]  ;;  %v1021_v15 = vld [vmem:[#allocation4 + $0x158] sm:$0xff] }
 0x1fc   :  { %2774 = vpow2.f32 %v896_v14 }
 0x1fd   :  { %1883 = vmatprep.subr.bf16.mxu0 %v2425_v18 }
 0x1fe   :  { %1884 = vmatpush1.bf16.msra.mxu0 %v2424_v17 }
 0x1ff   :  { %1885 = vmatprep.subr.bf16.mxu0 %v2409_v26 }
 0x202   :  { %1886 = vmatpush1.bf16.msra.mxu0 %v2408_v25 }
 0x209   :  { %v2775_v29 = vpop.eup %2774 }
 0x20a   :  { %v902_v33 = vmul.f32 %v2775_v29, %v900_v27  ;;  %v1092_v27 = vld [vmem:[#allocation4 + $0x390] sm:$0xff]  ;;  %v1093_v29 = vld [vmem:[#allocation4 + $0x398] sm:$0xff] }
 0x20b   :  { %v2522_v32 = vcombine.low %v1092_v27, %v1100_v28  ;;  %v2524_v36 = vcombine.low %v1093_v29, %v1101_v34  ;;  %v2525_v37 = vcombine.high %v1093_v29, %v1101_v34  ;;  %v988_v29 = vld [vmem:[#allocation4 + $0x50] sm:$0xff] }
 0x20c   :  { %904 = vrot.lane.b32.xlu0 %v902_v33, %s2879_s5  ;;  %v2523_v33 = vcombine.high %v1092_v27, %v1100_v28  ;;  %v980_v28 = vld [vmem:[#allocation4 + $0x10] sm:$0xff] }
 0x20d   :  { %1953 = vmatprep.subr.bf16.mxu0 %v2525_v37  ;;  %v2411_v37 = vcombine.high %v980_v28, %v988_v29 }
 0x26a   :  { %v2316_v45 = vpop.permute.xlu1 %2315 }
 0x27e   :  { %v905_v41 = vpop.permute.xlu0 %904 }
 0x27f   :  { %v907_v44 = vadd.f32 %v905_v41, %v892_v11  ;;  %v994_v11 = vld [vmem:[#allocation4 + $0x80] sm:$0xff] }
 0x280   :  { %v2423_v14 = vcombine.high %v994_v11, %v1002_v12  ;;  %v2422_v16 = vcombine.low %v994_v11, %v1002_v12  ;;  %v1012_v12 = vld [vmem:[#allocation4 + $0x110] sm:$0xff] }
 0x281   :  { %v908_v46 = vpack.c.bf16 %v907_v44, %v907_v44  ;;  %v2318_v47 = vsel %vm932_vm1, %v907_v44, %v2316_v45  ;;  %v1076_v44 = vld [vmem:[#allocation4 + $0x310] sm:$0xff]  ;;  %v2443_v18 = vcombine.high %v1012_v12, %v1020_v13 }
 0x282   :  { %v2320_v49 = vsel %vm2319_vm2, %v2318_v47, 0.0  ;;  %v1084_v45 = vld [vmem:[#allocation4 + $0x350] sm:$0xff]  ;;  %v1085_v47 = vld [vmem:[#allocation4 + $0x358] sm:$0xff] }
 0x283   :  { %2321 = vst [vmem:[%s3154_s12] sm:$0x3] %v2320_v49  ;;  %2690 = vmatmul.mubr.msk.bf16.vlgmr.msra.gmra.mxu1 %vm932_vm1, %v908_v46  ;;  %v1077_v46 = vld [vmem:[#allocation4 + $0x318] sm:$0xff]  ;;  %v2507_v50 = vcombine.high %v1076_v44, %v1084_v45 }
 0x284   :  { %1831 = vmatpush1.bf16.msra.mxu1 %v2518_v19  ;;  %v978_v19 = vld [vmem:[#allocation4] sm:$0xff]  ;;  %1862 = vmatprep.mubr.bf16.mxu1 %v2880_v31  ;;  %v2509_v51 = vcombine.high %v1077_v46, %v1085_v47 }
 0x285   :  { %1832 = vmatprep.subr.bf16.mxu1 %v2503_v48  ;;  %v2407_v22 = vcombine.high %v978_v19, %v986_v20  ;;  %v2406_v24 = vcombine.low %v978_v19, %v986_v20  ;;  %v996_v20 = vld [vmem:[#allocation4 + $0x90] sm:$0xff] }
 0x286   :  { %v2427_v26 = vcombine.high %v996_v20, %v1004_v21  ;;  %v2426_v34 = vcombine.low %v996_v20, %v1004_v21 }
 0x288   :  { %1833 = vmatpush1.bf16.msra.mxu1 %v2502_v52  ;;  %v1060_v52 = vld [vmem:[#allocation4 + $0x290] sm:$0xff] }
 0x289   :  { %1834 = vmatprep.subr.bf16.mxu1 %v2487_v53  ;;  %v1068_v53 = vld [vmem:[#allocation4 + $0x2d0] sm:$0xff] }
 0x28c   :  { %1835 = vmatpush1.bf16.msra.mxu1 %v2486_v56  ;;  %v2506_v56 = vcombine.low %v1076_v44, %v1084_v45 }
 0x28d   :  { %1836 = vmatprep.subr.bf16.mxu1 %v2471_v57  ;;  %v2508_v57 = vcombine.low %v1077_v46, %v1085_v47  ;;  %v1078_v47 = vld [vmem:[#allocation4 + $0x320] sm:$0xff] }
 0x290   :  { %1837 = vmatpush1.bf16.msra.mxu1 %v2470_v58  ;;  %v2491_v58 = vcombine.high %v1060_v52, %v1068_v53 }
 0x291   :  { %1838 = vmatprep.subr.bf16.mxu1 %v2455_v62  ;;  %v1045_v62 = vld [vmem:[#allocation4 + $0x218] sm:$0xff] }
 0x292   :  { %v2477_v3 = vcombine.high %v1045_v62, %v1053_v63  ;;  %v2476_v9 = vcombine.low %v1045_v62, %v1053_v63 }
 0x294   :  { %1839 = vmatpush1.bf16.msra.mxu1 %v2454_v0  ;;  %v2490_v0 = vcombine.low %v1060_v52, %v1068_v53 }
 0x295   :  { %1840 = vmatprep.subr.bf16.mxu1 %v2439_v6  ;;  %v1029_v6 = vld [vmem:[#allocation4 + $0x198] sm:$0xff] }
 0x296   :  { %v2461_v11 = vcombine.high %v1029_v6, %v1037_v7  ;;  %v2460_v17 = vcombine.low %v1029_v6, %v1037_v7 }
 0x298   :  { %1841 = vmatpush1.bf16.msra.mxu1 %v2438_v8  ;;  %v2474_v8 = vcombine.low %v1044_v60, %v1052_v61 }
 0x299   :  { %1842 = vmatprep.subr.bf16.mxu1 %v2423_v14  ;;  %v1013_v14 = vld [vmem:[#allocation4 + $0x118] sm:$0xff] }
 0x29a   :  { %v2445_v19 = vcombine.high %v1013_v14, %v1021_v15  ;;  %v2444_v25 = vcombine.low %v1013_v14, %v1021_v15 }
 0x29c   :  { %1843 = vmatpush1.bf16.msra.mxu1 %v2422_v16  ;;  %v2458_v16 = vcombine.low %v1028_v4, %v1036_v5 }
 0x29d   :  { %1844 = vmatprep.subr.bf16.mxu1 %v2407_v22  ;;  %v997_v22 = vld [vmem:[#allocation4 + $0x98] sm:$0xff] }
 0x29e   :  { %v2429_v27 = vcombine.high %v997_v22, %v1005_v23 }
 0x2a0   :  { %1845 = vmatpush1.bf16.msra.mxu1 %v2406_v24  ;;  %v2442_v24 = vcombine.low %v1012_v12, %v1020_v13 }
 0x2a1   :  { %1912 = vmatprep.subr.bf16.mxu1 %v2523_v33  ;;  %v989_v33 = vld [vmem:[#allocation4 + $0x58] sm:$0xff] }
 0x343   :  { %v970_v39 = vpop.f32.mrf.mxu1 }
 0x344   :  { %v971_v40 = vadd.f32 %v2402_v38, %v970_v39  ;;  %v1094_v39 = vld [vmem:[#allocation4 + $0x3a0] sm:$0xff] }
 0x345   :  { %v2691_v41 = vpop.f32.mrf.mxu1 }
 0x346   :  { %2776 = vtanh.f32 %v971_v40  ;;  %v1102_v40 = vld [vmem:[#allocation4 + $0x3e0] sm:$0xff]  ;;  %v1095_v41 = vld [vmem:[#allocation4 + $0x3a8] sm:$0xff] }
 0x347   :  { %v973_v42 = vpop.f32.mrf.mxu1  ;;  %v2527_v45 = vcombine.high %v1094_v39, %v1102_v40  ;;  %v2526_v52 = vcombine.low %v1094_v39, %v1102_v40 }
 0x348   :  { %v1103_v42 = vld [vmem:[#allocation4 + $0x3e8] sm:$0xff] }
 0x349   :  { %v2692_v43 = vpop.f32.mrf.mxu1  ;;  %v2529_v46 = vcombine.high %v1095_v41, %v1103_v42  ;;  %v2528_v53 = vcombine.low %v1095_v41, %v1103_v42 }
 0x34a   :  { %v2410_v43 = vcombine.low %v980_v28, %v988_v29 }
 0x353   :  { %v2777_v48 = vpop.eup %2776 }
 0x354   :  { %v3060_v49 = vpack.c.bf16 %v2777_v48, %v2777_v48  ;;  %v1086_v48 = vld [vmem:[#allocation4 + $0x360] sm:$0xff] }
 0x355   :  { %v2511_v54 = vcombine.high %v1078_v47, %v1086_v48  ;;  %v2510_v60 = vcombine.low %v1078_v47, %v1086_v48 }
 0x356   :  { %1863 = vmatmul.mubr.bf16.vlgmr.msra.gmra.mxu1 %v3060_v49  ;;  %1904 = vmatmul.mubr.bf16.vlgmr.msra.gmra.mxu0 %v3060_v49 }
 0x357   :  { %1913 = vmatpush1.bf16.msra.mxu1 %v2522_v32  ;;  %1954 = vmatpush1.bf16.msra.mxu0 %v2524_v36  ;;  %v981_v32 = vld [vmem:[#allocation4 + $0x18] sm:$0xff]  ;;  %v2428_v36 = vcombine.low %v997_v22, %v1005_v23 }
 0x358   :  { %1914 = vmatprep.subr.bf16.mxu1 %v2507_v50  ;;  %1955 = vmatprep.subr.bf16.mxu0 %v2509_v51  ;;  %v2413_v38 = vcombine.high %v981_v32, %v989_v33  ;;  %v2412_v44 = vcombine.low %v981_v32, %v989_v33  ;;  %v1079_v50 = vld [vmem:[#allocation4 + $0x328] sm:$0xff] }
 0x359   :  { %1944 = vmatprep.mubr.bf16.mxu1 %v2880_v31  ;;  %1985 = vmatprep.mubr.bf16.mxu0 %v2880_v31  ;;  %v1087_v51 = vld [vmem:[#allocation4 + $0x368] sm:$0xff] }
 0x35a   :  { %v2513_v55 = vcombine.high %v1079_v50, %v1087_v51  ;;  %v2512_v61 = vcombine.low %v1079_v50, %v1087_v51 }
 0x35b   :  { %1915 = vmatpush1.bf16.msra.mxu1 %v2506_v56  ;;  %1956 = vmatpush1.bf16.msra.mxu0 %v2508_v57  ;;  %v1062_v56 = vld [vmem:[#allocation4 + $0x2a0] sm:$0xff] }
 0x35c   :  { %1916 = vmatprep.subr.bf16.mxu1 %v2491_v58  ;;  %1957 = vmatprep.subr.bf16.mxu0 %v2493_v59  ;;  %v1070_v57 = vld [vmem:[#allocation4 + $0x2e0] sm:$0xff]  ;;  %v1063_v58 = vld [vmem:[#allocation4 + $0x2a8] sm:$0xff] }
 0x35d   :  { %v1071_v59 = vld [vmem:[#allocation4 + $0x2e8] sm:$0xff]  ;;  %v2495_v62 = vcombine.high %v1062_v56, %v1070_v57  ;;  %v2494_v4 = vcombine.low %v1062_v56, %v1070_v57 }
 0x35e   :  { %v2497_v63 = vcombine.high %v1063_v58, %v1071_v59  ;;  %v2496_v5 = vcombine.low %v1063_v58, %v1071_v59 }
 0x35f   :  { %1917 = vmatpush1.bf16.msra.mxu1 %v2490_v0  ;;  %1958 = vmatpush1.bf16.msra.mxu0 %v2492_v1  ;;  %v1046_v0 = vld [vmem:[#allocation4 + $0x220] sm:$0xff] }
 0x360   :  { %1918 = vmatprep.subr.bf16.mxu1 %v2475_v2  ;;  %1959 = vmatprep.subr.bf16.mxu0 %v2477_v3  ;;  %v1054_v1 = vld [vmem:[#allocation4 + $0x260] sm:$0xff]  ;;  %v1047_v2 = vld [vmem:[#allocation4 + $0x228] sm:$0xff] }
 0x361   :  { %v1055_v3 = vld [vmem:[#allocation4 + $0x268] sm:$0xff]  ;;  %v2479_v6 = vcombine.high %v1046_v0, %v1054_v1  ;;  %v2478_v12 = vcombine.low %v1046_v0, %v1054_v1 }
 0x362   :  { %v2481_v7 = vcombine.high %v1047_v2, %v1055_v3  ;;  %v2480_v13 = vcombine.low %v1047_v2, %v1055_v3 }
 0x363   :  { %1919 = vmatpush1.bf16.msra.mxu1 %v2474_v8  ;;  %1960 = vmatpush1.bf16.msra.mxu0 %v2476_v9  ;;  %v1030_v8 = vld [vmem:[#allocation4 + $0x1a0] sm:$0xff] }
 0x364   :  { %1920 = vmatprep.subr.bf16.mxu1 %v2459_v10  ;;  %1961 = vmatprep.subr.bf16.mxu0 %v2461_v11  ;;  %v1038_v9 = vld [vmem:[#allocation4 + $0x1e0] sm:$0xff]  ;;  %v1031_v10 = vld [vmem:[#allocation4 + $0x1a8] sm:$0xff] }
 0x365   :  { %v1039_v11 = vld [vmem:[#allocation4 + $0x1e8] sm:$0xff]  ;;  %v2463_v14 = vcombine.high %v1030_v8, %v1038_v9  ;;  %v2462_v20 = vcombine.low %v1030_v8, %v1038_v9 }
 0x366   :  { %v2465_v15 = vcombine.high %v1031_v10, %v1039_v11  ;;  %v2464_v21 = vcombine.low %v1031_v10, %v1039_v11 }
 0x367   :  { %1921 = vmatpush1.bf16.msra.mxu1 %v2458_v16  ;;  %1962 = vmatpush1.bf16.msra.mxu0 %v2460_v17  ;;  %v1014_v16 = vld [vmem:[#allocation4 + $0x120] sm:$0xff] }
 0x368   :  { %1922 = vmatprep.subr.bf16.mxu1 %v2443_v18  ;;  %1963 = vmatprep.subr.bf16.mxu0 %v2445_v19  ;;  %v1022_v17 = vld [vmem:[#allocation4 + $0x160] sm:$0xff]  ;;  %v1015_v18 = vld [vmem:[#allocation4 + $0x128] sm:$0xff] }
 0x369   :  { %v1023_v19 = vld [vmem:[#allocation4 + $0x168] sm:$0xff]  ;;  %v2447_v22 = vcombine.high %v1014_v16, %v1022_v17  ;;  %v2446_v28 = vcombine.low %v1014_v16, %v1022_v17 }
 0x36a   :  { %v2449_v23 = vcombine.high %v1015_v18, %v1023_v19  ;;  %v2448_v29 = vcombine.low %v1015_v18, %v1023_v19  ;;  %v1016_v19 = vld [vmem:[#allocation4 + $0x130] sm:$0xff] }
 0x36b   :  { %1923 = vmatpush1.bf16.msra.mxu1 %v2442_v24  ;;  %1964 = vmatpush1.bf16.msra.mxu0 %v2444_v25  ;;  %v998_v24 = vld [vmem:[#allocation4 + $0xa0] sm:$0xff] }
 0x36c   :  { %1924 = vmatprep.subr.bf16.mxu1 %v2427_v26  ;;  %1965 = vmatprep.subr.bf16.mxu0 %v2429_v27  ;;  %v1006_v25 = vld [vmem:[#allocation4 + $0xe0] sm:$0xff]  ;;  %v999_v26 = vld [vmem:[#allocation4 + $0xa8] sm:$0xff] }
 0x36d   :  { %v1007_v27 = vld [vmem:[#allocation4 + $0xe8] sm:$0xff]  ;;  %v2431_v32 = vcombine.high %v998_v24, %v1006_v25  ;;  %v2430_v39 = vcombine.low %v998_v24, %v1006_v25 }
 0x36e   :  { %v2433_v33 = vcombine.high %v999_v26, %v1007_v27  ;;  %v2432_v40 = vcombine.low %v999_v26, %v1007_v27  ;;  %v1000_v27 = vld [vmem:[#allocation4 + $0xb0] sm:$0xff] }
 0x36f   :  { %1925 = vmatpush1.bf16.msra.mxu1 %v2426_v34  ;;  %1966 = vmatpush1.bf16.msra.mxu0 %v2428_v36  ;;  %v982_v34 = vld [vmem:[#allocation4 + $0x20] sm:$0xff] }
 0x370   :  { %1926 = vmatprep.subr.bf16.mxu1 %v2411_v37  ;;  %1967 = vmatprep.subr.bf16.mxu0 %v2413_v38  ;;  %v990_v36 = vld [vmem:[#allocation4 + $0x60] sm:$0xff]  ;;  %v983_v37 = vld [vmem:[#allocation4 + $0x28] sm:$0xff] }
 0x371   :  { %v991_v38 = vld [vmem:[#allocation4 + $0x68] sm:$0xff]  ;;  %v2415_v41 = vcombine.high %v982_v34, %v990_v36  ;;  %v2414_v47 = vcombine.low %v982_v34, %v990_v36 }
 0x372   :  { %v2417_v42 = vcombine.high %v983_v37, %v991_v38  ;;  %v2416_v48 = vcombine.low %v983_v37, %v991_v38  ;;  %v984_v38 = vld [vmem:[#allocation4 + $0x30] sm:$0xff] }
 0x373   :  { %1927 = vmatpush1.bf16.msra.mxu1 %v2410_v43  ;;  %1968 = vmatpush1.bf16.msra.mxu0 %v2412_v44  ;;  %v1096_v43 = vld [vmem:[#allocation4 + $0x3b0] sm:$0xff] }
 0x374   :  { %1994 = vmatprep.subr.bf16.mxu1 %v2527_v45  ;;  %2035 = vmatprep.subr.bf16.mxu0 %v2529_v46  ;;  %v1104_v44 = vld [vmem:[#allocation4 + $0x3f0] sm:$0xff]  ;;  %v1097_v45 = vld [vmem:[#allocation4 + $0x3b8] sm:$0xff] }
 0x375   :  { %v1105_v46 = vld [vmem:[#allocation4 + $0x3f8] sm:$0xff]  ;;  %v2531_v50 = vcombine.high %v1096_v43, %v1104_v44  ;;  %v2530_v56 = vcombine.low %v1096_v43, %v1104_v44 }
 0x376   :  { %1945 = vmatmul.mubr.bf16.vlgmr.msra.gmra.mxu1 %v3060_v49  ;;  %1986 = vmatmul.mubr.bf16.vlgmr.msra.gmra.mxu0 %v3060_v49  ;;  %v2533_v51 = vcombine.high %v1097_v45, %v1105_v46  ;;  %v2532_v57 = vcombine.low %v1097_v45, %v1105_v46 }
 0x377   :  { %1995 = vmatpush1.bf16.msra.mxu1 %v2526_v52  ;;  %2036 = vmatpush1.bf16.msra.mxu0 %v2528_v53  ;;  %v1080_v52 = vld [vmem:[#allocation4 + $0x330] sm:$0xff] }
 0x378   :  { %1996 = vmatprep.subr.bf16.mxu1 %v2511_v54  ;;  %2037 = vmatprep.subr.bf16.mxu0 %v2513_v55  ;;  %v1088_v53 = vld [vmem:[#allocation4 + $0x370] sm:$0xff]  ;;  %v1081_v54 = vld [vmem:[#allocation4 + $0x338] sm:$0xff] }
 0x379   :  { %2026 = vmatprep.mubr.bf16.mxu1 %v2880_v31  ;;  %2067 = vmatprep.mubr.bf16.mxu0 %v2880_v31  ;;  %v1089_v55 = vld [vmem:[#allocation4 + $0x378] sm:$0xff]  ;;  %v2515_v58 = vcombine.high %v1080_v52, %v1088_v53  ;;  %v2514_v0 = vcombine.low %v1080_v52, %v1088_v53  ;;  %v1116_v52 = vsub.s32 1, %v2952_v30  ;;  %v1124_v53 = vsub.s32 3, %v2952_v30 }
 0x37a   :  { %v2517_v59 = vcombine.high %v1081_v54, %v1089_v55  ;;  %v2516_v1 = vcombine.low %v1081_v54, %v1089_v55 }
 0x37b   :  { %1997 = vmatpush1.bf16.msra.mxu1 %v2510_v60  ;;  %2038 = vmatpush1.bf16.msra.mxu0 %v2512_v61  ;;  %v1064_v60 = vld [vmem:[#allocation4 + $0x2b0] sm:$0xff] }
 0x37c   :  { %1998 = vmatprep.subr.bf16.mxu1 %v2495_v62  ;;  %2039 = vmatprep.subr.bf16.mxu0 %v2497_v63  ;;  %v1072_v61 = vld [vmem:[#allocation4 + $0x2f0] sm:$0xff]  ;;  %v1065_v62 = vld [vmem:[#allocation4 + $0x2b8] sm:$0xff] }
 0x37d   :  { %v1073_v63 = vld [vmem:[#allocation4 + $0x2f8] sm:$0xff]  ;;  %v2499_v2 = vcombine.high %v1064_v60, %v1072_v61  ;;  %v2498_v8 = vcombine.low %v1064_v60, %v1072_v61 }
 0x37e   :  { %v2501_v3 = vcombine.high %v1065_v62, %v1073_v63  ;;  %v2500_v9 = vcombine.low %v1065_v62, %v1073_v63 }
 0x37f   :  { %1999 = vmatpush1.bf16.msra.mxu1 %v2494_v4  ;;  %2040 = vmatpush1.bf16.msra.mxu0 %v2496_v5  ;;  %v1048_v4 = vld [vmem:[#allocation4 + $0x230] sm:$0xff] }
 0x380   :  { %2000 = vmatprep.subr.bf16.mxu1 %v2479_v6  ;;  %2041 = vmatprep.subr.bf16.mxu0 %v2481_v7  ;;  %v1056_v5 = vld [vmem:[#allocation4 + $0x270] sm:$0xff]  ;;  %v1049_v6 = vld [vmem:[#allocation4 + $0x238] sm:$0xff] }
 0x381   :  { %v1057_v7 = vld [vmem:[#allocation4 + $0x278] sm:$0xff]  ;;  %v2483_v10 = vcombine.high %v1048_v4, %v1056_v5  ;;  %v2482_v16 = vcombine.low %v1048_v4, %v1056_v5 }
 0x382   :  { %v2485_v11 = vcombine.high %v1049_v6, %v1057_v7  ;;  %v2484_v17 = vcombine.low %v1049_v6, %v1057_v7 }
 0x383   :  { %2001 = vmatpush1.bf16.msra.mxu1 %v2478_v12  ;;  %2042 = vmatpush1.bf16.msra.mxu0 %v2480_v13  ;;  %v1032_v12 = vld [vmem:[#allocation4 + $0x1b0] sm:$0xff] }
 0x384   :  { %2002 = vmatprep.subr.bf16.mxu1 %v2463_v14  ;;  %2043 = vmatprep.subr.bf16.mxu0 %v2465_v15  ;;  %v1040_v13 = vld [vmem:[#allocation4 + $0x1f0] sm:$0xff]  ;;  %v1033_v14 = vld [vmem:[#allocation4 + $0x1b8] sm:$0xff] }
 0x385   :  { %v1041_v15 = vld [vmem:[#allocation4 + $0x1f8] sm:$0xff]  ;;  %v2467_v18 = vcombine.high %v1032_v12, %v1040_v13 }
 0x386   :  { %v2468_v24 = vcombine.low %v1033_v14, %v1041_v15 }
 0x387   :  { %2003 = vmatpush1.bf16.msra.mxu1 %v2462_v20  ;;  %2044 = vmatpush1.bf16.msra.mxu0 %v2464_v21  ;;  %v1024_v20 = vld [vmem:[#allocation4 + $0x170] sm:$0xff]  ;;  %v1017_v21 = vld [vmem:[#allocation4 + $0x138] sm:$0xff] }
 0x388   :  { %2004 = vmatprep.subr.bf16.mxu1 %v2447_v22  ;;  %2045 = vmatprep.subr.bf16.mxu0 %v2449_v23  ;;  %v1025_v22 = vld [vmem:[#allocation4 + $0x178] sm:$0xff]  ;;  %v2466_v23 = vcombine.low %v1032_v12, %v1040_v13  ;;  %v2451_v25 = vcombine.high %v1016_v19, %v1024_v20 }
 0x389   :  { %v2453_v26 = vcombine.high %v1017_v21, %v1025_v22  ;;  %v2452_v34 = vcombine.low %v1017_v21, %v1025_v22 }
 0x38b   :  { %2005 = vmatpush1.bf16.msra.mxu1 %v2446_v28  ;;  %2046 = vmatpush1.bf16.msra.mxu0 %v2448_v29  ;;  %v1008_v28 = vld [vmem:[#allocation4 + $0xf0] sm:$0xff]  ;;  %v1001_v29 = vld [vmem:[#allocation4 + $0xb8] sm:$0xff] }
 0x38c   :  { %2006 = vmatprep.subr.bf16.mxu1 %v2431_v32  ;;  %2047 = vmatprep.subr.bf16.mxu0 %v2433_v33  ;;  %v1009_v32 = vld [vmem:[#allocation4 + $0xf8] sm:$0xff]  ;;  %v2450_v33 = vcombine.low %v1016_v19, %v1024_v20  ;;  %v2435_v36 = vcombine.high %v1000_v27, %v1008_v28  ;;  %v1140_v19 = vsub.s32 7, %v2952_v30 }
 0x38d   :  { %v2437_v37 = vcombine.high %v1001_v29, %v1009_v32  ;;  %v2436_v43 = vcombine.low %v1001_v29, %v1009_v32 }
 0x38f   :  { %2007 = vmatpush1.bf16.msra.mxu1 %v2430_v39  ;;  %2048 = vmatpush1.bf16.msra.mxu0 %v2432_v40  ;;  %v992_v39 = vld [vmem:[#allocation4 + $0x70] sm:$0xff]  ;;  %v985_v40 = vld [vmem:[#allocation4 + $0x38] sm:$0xff] }
 0x390   :  { %2008 = vmatprep.subr.bf16.mxu1 %v2415_v41  ;;  %2049 = vmatprep.subr.bf16.mxu0 %v2417_v42  ;;  %v993_v41 = vld [vmem:[#allocation4 + $0x78] sm:$0xff]  ;;  %v2434_v42 = vcombine.low %v1000_v27, %v1008_v28  ;;  %v2419_v44 = vcombine.high %v984_v38, %v992_v39  ;;  %v2418_v46 = vcombine.low %v984_v38, %v992_v39 }
 0x391   :  { %v2421_v45 = vcombine.high %v985_v40, %v993_v41 }
 0x393   :  { %2009 = vmatpush1.bf16.msra.mxu1 %v2414_v47  ;;  %2050 = vmatpush1.bf16.msra.mxu0 %v2416_v48  ;;  %v2420_v47 = vcombine.low %v985_v40, %v993_v41  ;;  %v1112_v48 = vsub.s32 0, %v2952_v30 }
 0x394   :  { %2076 = vmatprep.subr.bf16.mxu1 %v2531_v50  ;;  %2117 = vmatprep.subr.bf16.mxu0 %v2533_v51  ;;  %v1120_v50 = vsub.s32 2, %v2952_v30  ;;  %v1106_v51 = vld [vmem:[%s3151_s9] sm:$0xff] }
 0x395   :  { %v1113_v54 = vrot.slane %v1106_v51, %v1112_v48 }
 0x396   :  { %2027 = vmatmul.mubr.bf16.vlgmr.msra.gmra.mxu1 %v3060_v49  ;;  %2068 = vmatmul.mubr.bf16.vlgmr.msra.gmra.mxu0 %v3060_v49  ;;  %v1121_v55 = vrot.slane %v1106_v51, %v1120_v50 }
 0x397   :  { %2077 = vmatpush1.bf16.msra.mxu1 %v2530_v56  ;;  %2118 = vmatpush1.bf16.msra.mxu0 %v2532_v57  ;;  %v1125_v56 = vrot.slane %v1106_v51, %v1124_v53 }
 0x398   :  { %2078 = vmatprep.subr.bf16.mxu1 %v2515_v58  ;;  %2119 = vmatprep.subr.bf16.mxu0 %v2517_v59 }
 0x399   :  { %2108 = vmatprep.mubr.bf16.mxu1 %v2880_v31  ;;  %2149 = vmatprep.mubr.bf16.mxu0 %v2880_v31  ;;  %v2469_v31 = vcombine.high %v1033_v14, %v1041_v15 }
 0x39b   :  { %2079 = vmatpush1.bf16.msra.mxu1 %v2514_v0  ;;  %2120 = vmatpush1.bf16.msra.mxu0 %v2516_v1 }
 0x39c   :  { %2080 = vmatprep.subr.bf16.mxu1 %v2499_v2  ;;  %2121 = vmatprep.subr.bf16.mxu0 %v2501_v3 }
 0x39f   :  { %2081 = vmatpush1.bf16.msra.mxu1 %v2498_v8  ;;  %2122 = vmatpush1.bf16.msra.mxu0 %v2500_v9 }
 0x3a0   :  { %2082 = vmatprep.subr.bf16.mxu1 %v2483_v10  ;;  %2123 = vmatprep.subr.bf16.mxu0 %v2485_v11 }
 0x3a3   :  { %2083 = vmatpush1.bf16.msra.mxu1 %v2482_v16  ;;  %2124 = vmatpush1.bf16.msra.mxu0 %v2484_v17  ;;  %v1128_v17 = vsub.s32 4, %v2952_v30 }
 0x3a4   :  { %2084 = vmatprep.subr.bf16.mxu1 %v2467_v18  ;;  %2125 = vmatprep.subr.bf16.mxu0 %v2469_v31  ;;  %v1136_v18 = vsub.s32 6, %v2952_v30  ;;  %v1132_v31 = vsub.s32 5, %v2952_v30 }
 0x3a5   :  { %v1129_v20 = vrot.slane %v1106_v51, %v1128_v17 }
 0x3a6   :  { %v1137_v21 = vrot.slane %v1106_v51, %v1136_v18  ;;  %v1133_v22 = vrot.slane %v1106_v51, %v1132_v31 }
 0x3a7   :  { %2085 = vmatpush1.bf16.msra.mxu1 %v2466_v23  ;;  %2126 = vmatpush1.bf16.msra.mxu0 %v2468_v24  ;;  %v1141_v23 = vrot.slane %v1106_v51, %v1140_v19 }
 0x3a8   :  { %2086 = vmatprep.subr.bf16.mxu1 %v2451_v25  ;;  %2127 = vmatprep.subr.bf16.mxu0 %v2453_v26 }
 0x3ab   :  { %2087 = vmatpush1.bf16.msra.mxu1 %v2450_v33  ;;  %2128 = vmatpush1.bf16.msra.mxu0 %v2452_v34 }
 0x3ac   :  { %2088 = vmatprep.subr.bf16.mxu1 %v2435_v36  ;;  %2129 = vmatprep.subr.bf16.mxu0 %v2437_v37 }
 0x3af   :  { %2089 = vmatpush1.bf16.msra.mxu1 %v2434_v42  ;;  %2130 = vmatpush1.bf16.msra.mxu0 %v2436_v43 }
 0x3b0   :  { %2090 = vmatprep.subr.bf16.mxu1 %v2419_v44  ;;  %2131 = vmatprep.subr.bf16.mxu0 %v2421_v45 }
 0x3b3   :  { %2091 = vmatpush1.bf16.msra.mxu1 %v2418_v46  ;;  %2132 = vmatpush1.bf16.msra.mxu0 %v2420_v47 }
 0x3b6   :  { %2109 = vmatmul.mubr.bf16.vlgmr.msra.gmra.mxu1 %v3060_v49  ;;  %2150 = vmatmul.mubr.bf16.vlgmr.msra.gmra.mxu0 %v3060_v49  ;;  %v1117_v49 = vrot.slane %v1106_v51, %v1116_v52 }
 0x416   :  { %v1864_v57 = vpop.f32.mrf.mxu1  ;;  %v1905_v58 = vpop.f32.mrf.mxu0 }
 0x417   :  { %v1865_v59 = vadd.f32 %v1864_v57, %v1113_v54  ;;  %v1906_v60 = vadd.f32 %v1905_v58, %v1121_v55 }
 0x418   :  { %v1866_v61 = vpop.f32.mrf.mxu1  ;;  %v1907_v62 = vpop.f32.mrf.mxu0 }
 0x419   :  { %v2534_v63 = vmul.f32 -1.442695, %v1865_v59  ;;  %v2536_v0 = vmul.f32 -1.442695, %v1906_v60  ;;  %v1867_v1 = vadd.f32 %v1866_v61, %v1117_v49  ;;  %v1908_v2 = vadd.f32 %v1907_v62, %v1125_v56 }
 0x41a   :  { %v1868_v3 = vpop.f32.mrf.mxu1  ;;  %v1909_v4 = vpop.f32.mrf.mxu0 }
 0x41b   :  { %2778 = vpow2.f32 %v2534_v63  ;;  %v2535_v5 = vmul.f32 -1.442695, %v1867_v1  ;;  %v2537_v6 = vmul.f32 -1.442695, %v1908_v2 }
 0x41c   :  { %2780 = vpow2.f32 %v2536_v0  ;;  %v1869_v7 = vpop.f32.mrf.mxu1  ;;  %v1910_v8 = vpop.f32.mrf.mxu0  ;;  %v1107_v0 = vld [vmem:[%s3151_s9 + $0x8] sm:$0xff] }
 0x41d   :  { %2782 = vpow2.f32 %v2535_v5  ;;  %v1145_v1 = vrot.slane %v1107_v0, %v1112_v48  ;;  %v1153_v2 = vrot.slane %v1107_v0, %v1120_v50  ;;  %v1149_v3 = vrot.slane %v1107_v0, %v1116_v52 }
 0x41e   :  { %2784 = vpow2.f32 %v2537_v6  ;;  %v1157_v4 = vrot.slane %v1107_v0, %v1124_v53 }
 0x428   :  { %v2779_v9 = vpop.eup %2778 }
 0x429   :  { %v2781_v10 = vpop.eup %2780  ;;  %v2182_v11 = vadd.f32 1.0, %v2779_v9 }
 0x42a   :  { %v2783_v12 = vpop.eup %2782  ;;  %v2184_v13 = vadd.f32 1.0, %v2781_v10 }
 0x42b   :  { %v2785_v14 = vpop.eup %2784  ;;  %2786 = vrcp.f32 %v2182_v11  ;;  %v2183_v15 = vadd.f32 1.0, %v2783_v12 }
 0x42c   :  { %2788 = vrcp.f32 %v2184_v13  ;;  %v2185_v16 = vadd.f32 1.0, %v2785_v14 }
 0x42d   :  { %2790 = vrcp.f32 %v2183_v15 }
 0x42e   :  { %2792 = vrcp.f32 %v2185_v16 }
 0x436   :  { %v1946_v24 = vpop.f32.mrf.mxu1  ;;  %v1987_v25 = vpop.f32.mrf.mxu0 }
 0x437   :  { %v1947_v26 = vadd.f32 %v1946_v24, %v1129_v20  ;;  %v1988_v27 = vadd.f32 %v1987_v25, %v1137_v21 }
 0x438   :  { %v2787_v28 = vpop.eup %2786  ;;  %v1948_v29 = vpop.f32.mrf.mxu1 }
 0x439   :  { %v1989_v32 = vpop.f32.mrf.mxu0  ;;  %v2789_v33 = vpop.eup %2788  ;;  %v2538_v34 = vmul.f32 -1.442695, %v1947_v26  ;;  %v2540_v36 = vmul.f32 -1.442695, %v1988_v27  ;;  %v1949_v37 = vadd.f32 %v1948_v29, %v1133_v22 }
 0x43a   :  { %v1990_v38 = vadd.f32 %v1989_v32, %v1141_v23  ;;  %v2791_v39 = vpop.eup %2790  ;;  %v1950_v40 = vpop.f32.mrf.mxu1 }
 0x43b   :  { %v1991_v41 = vpop.f32.mrf.mxu0  ;;  %v2793_v42 = vpop.eup %2792  ;;  %v2214_v43 = vcombine.low %v2787_v28, %v2791_v39  ;;  %2794 = vpow2.f32 %v2538_v34  ;;  %v2539_v44 = vmul.f32 -1.442695, %v1949_v37 }
 0x43c   :  { %v2541_v45 = vmul.f32 -1.442695, %v1990_v38  ;;  %v2215_v46 = vcombine.low %v2789_v33, %v2793_v42  ;;  %2796 = vpow2.f32 %v2540_v36  ;;  %v1951_v47 = vpop.f32.mrf.mxu1  ;;  %v1161_v41 = vrot.slane %v1107_v0, %v1128_v17 }
 0x43d   :  { %v1992_v51 = vpop.f32.mrf.mxu0  ;;  %v2222_v54 = vrot.slane %v2214_v43, %v2955_v35  ;;  %2798 = vpow2.f32 %v2539_v44  ;;  %v1169_v42 = vrot.slane %v1107_v0, %v1136_v18  ;;  %v1165_v43 = vrot.slane %v1107_v0, %v1132_v31 }
 0x43e   :  { %v2229_v55 = vrot.slane %v2215_v46, %v2955_v35  ;;  %2800 = vpow2.f32 %v2541_v45  ;;  %v1173_v44 = vrot.slane %v1107_v0, %v1140_v19 }
 0x440   :  { %v2230_v49 = vcombine.low %v2222_v54, %v2229_v55 }
 0x442   :  { %2250 = vst [vmem:[%s3152_s10] sm:$0xff] %v2230_v49 }
 0x448   :  { %v2795_v56 = vpop.eup %2794 }
 0x449   :  { %v2797_v57 = vpop.eup %2796  ;;  %v2186_v58 = vadd.f32 1.0, %v2795_v56 }
 0x44a   :  { %v2799_v59 = vpop.eup %2798  ;;  %v2188_v60 = vadd.f32 1.0, %v2797_v57 }
 0x44b   :  { %v2801_v61 = vpop.eup %2800  ;;  %2802 = vrcp.f32 %v2186_v58  ;;  %v2187_v62 = vadd.f32 1.0, %v2799_v59 }
 0x44c   :  { %2804 = vrcp.f32 %v2188_v60  ;;  %v2189_v63 = vadd.f32 1.0, %v2801_v61 }
 0x44d   :  { %2806 = vrcp.f32 %v2187_v62 }
 0x44e   :  { %2808 = vrcp.f32 %v2189_v63 }
 0x456   :  { %v2028_v5 = vpop.f32.mrf.mxu1  ;;  %v2069_v6 = vpop.f32.mrf.mxu0 }
 0x457   :  { %v2029_v7 = vadd.f32 %v2028_v5, %v1145_v1  ;;  %v2070_v8 = vadd.f32 %v2069_v6, %v1153_v2 }
 0x458   :  { %v2803_v9 = vpop.eup %2802  ;;  %v2030_v10 = vpop.f32.mrf.mxu1 }
 0x459   :  { %v2071_v11 = vpop.f32.mrf.mxu0  ;;  %v2805_v12 = vpop.eup %2804  ;;  %v2252_v13 = vmul.f32 1.442695, %v2029_v7  ;;  %v2256_v14 = vmul.f32 1.442695, %v2070_v8  ;;  %v2031_v48 = vadd.f32 %v2030_v10, %v1149_v3 }
 0x45a   :  { %v2072_v15 = vadd.f32 %v2071_v11, %v1157_v4  ;;  %v2807_v16 = vpop.eup %2806  ;;  %v2032_v50 = vpop.f32.mrf.mxu1 }
 0x45b   :  { %v2073_v20 = vpop.f32.mrf.mxu0  ;;  %v2809_v21 = vpop.eup %2808  ;;  %v2231_v52 = vcombine.low %v2803_v9, %v2807_v16  ;;  %2810 = vpow2.f32 %v2252_v13  ;;  %v2254_v22 = vmul.f32 1.442695, %v2031_v48 }
 0x45c   :  { %v2258_v53 = vmul.f32 1.442695, %v2072_v15  ;;  %v2232_v23 = vcombine.low %v2805_v12, %v2809_v21  ;;  %2812 = vpow2.f32 %v2256_v14  ;;  %v2033_v24 = vpop.f32.mrf.mxu1 }
 0x45d   :  { %v2074_v25 = vpop.f32.mrf.mxu0  ;;  %v2239_v26 = vrot.slane %v2231_v52, %v2955_v35  ;;  %2814 = vpow2.f32 %v2254_v22 }
 0x45e   :  { %v2246_v27 = vrot.slane %v2232_v23, %v2955_v35  ;;  %2816 = vpow2.f32 %v2258_v53 }
 0x460   :  { %v2247_v28 = vcombine.low %v2239_v26, %v2246_v27 }
 0x462   :  { %2251 = vst [vmem:[%s3152_s10 + $0x8] sm:$0xff] %v2247_v28 }
 0x468   :  { %v2811_v29 = vpop.eup %2810 }
 0x469   :  { %v2813_v32 = vpop.eup %2812 }
 0x46a   :  { %v2815_v33 = vpop.eup %2814 }
 0x46b   :  { %v2817_v34 = vpop.eup %2816  ;;  %v2276_v36 = vcombine.low %v2811_v29, %v2815_v33 }
 0x46c   :  { %v2277_v37 = vcombine.low %v2813_v32, %v2817_v34 }
 0x46d   :  { %v2284_v38 = vrot.slane %v2276_v36, %v2955_v35 }
 0x46e   :  { %v2291_v39 = vrot.slane %v2277_v37, %v2955_v35 }
 0x470   :  { %v2292_v40 = vcombine.low %v2284_v38, %v2291_v39 }
 0x472   :  { %2312 = vst [vmem:[%s3153_s11] sm:$0xff] %v2292_v40 }
 0x476   :  { %v2110_v45 = vpop.f32.mrf.mxu1  ;;  %v2151_v46 = vpop.f32.mrf.mxu0 }
 0x477   :  { %v2111_v47 = vadd.f32 %v2110_v45, %v1161_v41  ;;  %v2152_v51 = vadd.f32 %v2151_v46, %v1169_v42 }
 0x478   :  { %v2112_v54 = vpop.f32.mrf.mxu1  ;;  %v2153_v55 = vpop.f32.mrf.mxu0 }
 0x479   :  { %v2260_v49 = vmul.f32 1.442695, %v2111_v47  ;;  %v2264_v56 = vmul.f32 1.442695, %v2152_v51  ;;  %v2113_v57 = vadd.f32 %v2112_v54, %v1165_v43  ;;  %v2154_v58 = vadd.f32 %v2153_v55, %v1173_v44 }
 0x47a   :  { %v2114_v17 = vpop.f32.mrf.mxu1  ;;  %v2155_v59 = vpop.f32.mrf.mxu0 }
 0x47b   :  { %2818 = vpow2.f32 %v2260_v49  ;;  %v2262_v18 = vmul.f32 1.442695, %v2113_v57  ;;  %v2266_v60 = vmul.f32 1.442695, %v2154_v58 }
 0x47c   :  { %2820 = vpow2.f32 %v2264_v56  ;;  %v2115_v31 = vpop.f32.mrf.mxu1  ;;  %v2156_v61 = vpop.f32.mrf.mxu0 }
 0x47d   :  { %2822 = vpow2.f32 %v2262_v18 }
 0x47e   :  { %2824 = vpow2.f32 %v2266_v60 }
 0x488   :  { %v2819_v30 = vpop.eup %2818 }
 0x489   :  { %v2821_v19 = vpop.eup %2820 }
 0x48a   :  { %v2823_v62 = vpop.eup %2822 }
 0x48b   :  { %v2825_v63 = vpop.eup %2824  ;;  %v2293_v0 = vcombine.low %v2819_v30, %v2823_v62 }
 0x48c   :  { %v2294_v1 = vcombine.low %v2821_v19, %v2825_v63 }
 0x48d   :  { %v2301_v2 = vrot.slane %v2293_v0, %v2955_v35 }
 0x48e   :  { %v2308_v3 = vrot.slane %v2294_v1, %v2955_v35 }
 0x490   :  { %v2309_v4 = vcombine.low %v2301_v2, %v2308_v3 }
 0x492   :  { %2313 = vst [vmem:[%s3153_s11 + $0x8] sm:$0xff] %v2309_v4 }
 0x493   :  { %2334 = vsyncpa [#allocation3], 1 }
 0x494   :  { %2335 = vsyncpa [#allocation5], 1 }

</bundles_post_ra>
